<compile_context>
chip_gen: v7x
topology: tpu7x:2x2x1
jax: 0.10.0
libtpu: 0.0.40
codegen_flags: <defaults>
</compile_context>

<pallas_src>
import functools

import jax
import jax.numpy as jnp
from jax.experimental import pallas as pl
from jax.experimental.pallas import tpu as pltpu


N_PAD = 128   # MXU lane width for the weight / accumulator N dim (keep at 128).


def _round_up(x, m):
    return (x + m - 1) // m * m


def _cdiv(a, b):
    return -(-a // b)


# ----------------------------- Pallas kernel --------------------------------

def _conv3x3_kernel(x_ref, w_ref, b_ref, o_ref, *, tile_m, wp, slab, n_out):
    """Fused 3x3 'same' conv on a flattened, spatially padded NHWC image.

    x_ref: (1, Lpad, C)        bf16  zero-padded image of one batch element,
                                     flattened row-major over (H+2, wp).
    w_ref: (9, C, N_PAD)       bf16  tap-major weights, zero past n_out.
    b_ref: (1, N_PAD)          f32   bias, zero past n_out.
    o_ref: (1, tile_m, n_out)  bf16  one tile of flattened output rows
                                     (only the real channels are written back).

    Flat output row m = i*wp + j; tap (di, dj) contribution comes from flat
    input row m + di*wp + dj, i.e. a contiguous shifted slice — so the 3x3
    conv is 9 accumulated skinny matmuls with no im2col materialization.
    """
    mi = pl.program_id(1)
    m0 = pl.multiple_of(mi * tile_m, tile_m)

    # One aligned bf16 load of tile + halo; bf16 goes straight to the MXU
    # (f32 accumulation happens inside the MXU), no VPU upcast pass.
    xs = x_ref[0, pl.ds(m0, slab), :]                        # (slab, C) bf16
    span = tile_m + 2 * wp

    # Start the accumulator from the broadcast bias (saves a full-tile add).
    acc = jnp.broadcast_to(b_ref[...], (tile_m, b_ref.shape[-1]))  # (tile_m, N_PAD) f32

    # 3 dj-shifted views (dj=0 is free; dj=1,2 are single static shifts), each
    # reused for the 3 sublane-aligned di offsets (di*wp is a multiple of 8).
    for dj in range(3):
        xd = xs[dj:dj + span, :] if dj else xs[:span, :]
        for di in range(3):
            acc = acc + jnp.dot(xd[di * wp:di * wp + tile_m, :],
                                w_ref[3 * di + dj],
                                preferred_element_type=jnp.float32)

    # Narrow bf16 store: only the n_out real channels are written back to HBM.
    o_ref[0, :, :] = acc[:, :n_out].astype(o_ref.dtype)


def conv2d_3x3_pallas(x_nhwc, w9, bias, n_valid, *, tile_m=1024):
    """3x3 stride-1 'same' conv, NHWC in / NHWC out (bf16), Pallas TPU hot loop.

    x_nhwc: (B, H, W, C) float  (cast to bf16 once, before padding)
    w9:     (9, C, N_PAD) bf16  tap-major weights, zero past n_valid
    bias:   (1, N_PAD)    f32   zero past n_valid
    returns (B, H, W, n_valid) bf16
    """
    B, H, W, C = x_nhwc.shape
    wp = _round_up(W + 2, 8)           # row pitch: 'same' halo + aligned di*wp taps
    m_out = H * wp                     # flat output rows per batch (incl. j>=W cols)

    tile_m = min(int(tile_m), _round_up(m_out, 16))
    if B == 1 and m_out >= 32:
        # v7x megacore: with a single batch element, split the m axis so both
        # TensorCores get work (don't shrink below two tiles otherwise).
        tile_m = min(tile_m, _round_up(_cdiv(m_out, 2), 16))
    tile_m = _round_up(max(tile_m, 16), 16)

    m_pad = _round_up(m_out, tile_m)   # cdiv-style tail padding
    halo = _round_up(2 * wp + 2, 16)   # max tap offset, keeps slab a mult of 16
    slab = tile_m + halo
    l_need = m_pad + halo

    # Cast to bf16 FIRST, then one jnp.pad covers the spatial halo, the width
    # round-up to wp and the flat tail in a single HBM pass.
    extra_rows = _cdiv(max(l_need - (H + 2) * wp, 0), wp)
    xp = jnp.pad(x_nhwc.astype(jnp.bfloat16),
                 ((0, 0), (1, 1 + extra_rows), (1, wp - W - 1), (0, 0)))
    l_pad = (H + 2 + extra_rows) * wp
    xp = xp.reshape(B, l_pad, C)

    x_block_bytes = l_pad * C * 2
    if x_block_bytes > (4 << 20):
        # The per-batch image block is reused across every m tile, so a single
        # buffer suffices; halves VMEM at real VAE resolutions (v5e's 16 MiB
        # scoped default, v7x's 64 MiB physical VMEM).
        x_spec = pl.BlockSpec((1, l_pad, C), lambda b, m: (b, 0, 0),
                              pipeline_mode=pl.Buffered(1))
        x_bufs = 1
    else:
        x_spec = pl.BlockSpec((1, l_pad, C), lambda b, m: (b, 0, 0))
        x_bufs = 2
    # TODO(synk): for very large images (x block approaching VMEM capacity)
    # switch x to memory_space=pl.ANY and double-buffer a (slab, C) halo window
    # per m tile with pltpu.make_async_copy instead of holding the whole image.

    vmem_need = (x_bufs * x_block_bytes
                 + 2 * (int(w9.size) * 2 + int(bias.size) * 4
                        + tile_m * n_valid * 2)
                 + 3 * slab * C * 2 + tile_m * N_PAD * 4)
    vmem_limit = int(min(max(2 * vmem_need, 32 << 20), 64 << 20))

    cost = pl.CostEstimate(
        flops=2 * B * m_pad * 9 * C * N_PAD,
        transcendentals=0,
        bytes_accessed=int(B * l_pad * C * 2 + int(w9.size) * 2
                           + int(bias.size) * 4 + B * m_pad * n_valid * 2),
    )

    yflat = pl.pallas_call(
        functools.partial(_conv3x3_kernel, tile_m=tile_m, wp=wp, slab=slab,
                          n_out=n_valid),
        out_shape=jax.ShapeDtypeStruct((B, m_pad, n_valid), jnp.bfloat16),
        grid_spec=pltpu.PrefetchScalarGridSpec(
            num_scalar_prefetch=0,
            grid=(B, m_pad // tile_m),
            in_specs=[
                x_spec,
                pl.BlockSpec((9, C, N_PAD), lambda b, m: (0, 0, 0)),
                pl.BlockSpec((1, N_PAD), lambda b, m: (0, 0)),
            ],
            out_specs=pl.BlockSpec((1, tile_m, n_valid), lambda b, m: (b, m, 0)),
        ),
        compiler_params=pltpu.CompilerParams(
            dimension_semantics=("parallel", "parallel"),
            vmem_limit_bytes=vmem_limit),
        cost_estimate=cost,
    )(xp, w9, bias)

    # Drop tail rows and the j >= W garbage columns.  This pass reads only the
    # narrow bf16 output (not a 128-wide f32 slab) and fuses with the caller's
    # NHWC->NCHW transpose.
    y = yflat[:, :m_out, :].reshape(B, H, wp, n_valid)[:, :, :W, :]
    return y


# --------------------------- synthetic AE model ------------------------------

def _pack_conv_params(w_hwio, b_o):
    """(3,3,C,N), (N,) f32 -> tap-major bf16 weights + f32 bias, N -> N_PAD."""
    kh, kw, c, n = w_hwio.shape
    assert kh == 3 and kw == 3 and n <= N_PAD
    w9 = jnp.pad(w_hwio.reshape(kh * kw, c, n),
                 ((0, 0), (0, 0), (0, N_PAD - n))).astype(jnp.bfloat16)
    b = jnp.pad(b_o, (0, N_PAD - n)).astype(jnp.float32).reshape(1, N_PAD)
    return w9, b


class _SyntheticVideoAutoencoderKL:
    """Minimal VideoAutoencoderKL stand-in (single 3x3 conv encoder/decoder).

    encode: conv(x) -> posterior mean * scaling_factor  (logvar head dropped,
            scale folded into weights/bias at init)
    decode: conv(z / scaling_factor)                     (1/scale folded in)

    Activations/latents are kept in bf16 (kernel output dtype) — results match
    the f32 PyTorch reference to bf16 rounding (~3 decimal digits here).
    """

    def __init__(self, in_channels, latent_channels, out_channels,
                 scaling_factor, key):
        self.in_channels = in_channels
        self.latent_channels = latent_channels
        self.out_channels = out_channels
        self.scaling_factor = scaling_factor

        k_ew, k_eb, k_dw, k_db = jax.random.split(key, 4)
        enc_w = 0.05 * jax.random.normal(
            k_ew, (3, 3, in_channels, 2 * latent_channels), jnp.float32)
        enc_b = 0.01 * jax.random.normal(k_eb, (2 * latent_channels,), jnp.float32)
        dec_w = 0.05 * jax.random.normal(
            k_dw, (3, 3, latent_channels, out_channels), jnp.float32)
        dec_b = 0.01 * jax.random.normal(k_db, (out_channels,), jnp.float32)

        # Drop unused logvar half; fold scaling_factor into the linear convs.
        enc_w_mean = enc_w[..., :latent_channels] * scaling_factor
        enc_b_mean = enc_b[:latent_channels] * scaling_factor
        dec_w_s = dec_w / scaling_factor          # conv(z/s, w) == conv(z, w/s)

        self.enc_w9, self.enc_bp = _pack_conv_params(enc_w_mean, enc_b_mean)
        self.dec_w9, self.dec_bp = _pack_conv_params(dec_w_s, dec_b)

    def encode(self, x_nchw):
        x = jnp.transpose(x_nchw, (0, 2, 3, 1))             # NCHW -> NHWC
        lat = conv2d_3x3_pallas(x, self.enc_w9, self.enc_bp,
                                n_valid=self.latent_channels)
        return jnp.transpose(lat, (0, 3, 1, 2))             # NHWC -> NCHW (bf16)

    def decode(self, z_nchw):
        z = jnp.transpose(z_nchw, (0, 2, 3, 1))
        out = conv2d_3x3_pallas(z, self.dec_w9, self.dec_bp,
                                n_valid=self.out_channels)
        return jnp.transpose(out, (0, 3, 1, 2))


class AEModel:
    """JAX/Pallas port of the mindspeed_mm AEModel wrapper."""

    def __init__(self, config):
        self.config = dict(config)
        self.i2v_processor_config = self.config.pop("i2v_processor", None)
        # TODO(synk): I2VProcessor has no Pallas equivalent; only the
        # i2v_processor is None path is implemented.
        self.i2v_processor = None
        model_id = self.config.pop("model_id")
        assert model_id == "vae", "only the synthetic 'vae' mapping is implemented"
        self.model = _SyntheticVideoAutoencoderKL(**self.config)

    def get_model(self):
        return self.model

    def encode(self, x, **kwargs):
        video_latents = self.model.encode(x)
        if self.i2v_processor is None:
            return (video_latents, None)
        return (video_latents,
                self.i2v_processor(vae_model=self.model, videos=x,
                                   video_latents=video_latents, **kwargs))

    def decode(self, x):
        return self.model.decode(x)

    def forward(self, x):
        raise NotImplementedError("forward function is not implemented")


# -------------------------------- main ---------------------------------------

if __name__ == "__main__":
    B, C, H, W = 2, 4, 16, 16
    latent_channels, out_channels = 4, 3

    key = jax.random.PRNGKey(0)
    k_x, k_params = jax.random.split(key)
    x = jax.random.normal(k_x, (B, C, H, W), jnp.float32)

    config = {
        "model_id": "vae",
        "in_channels": C,
        "latent_channels": latent_channels,
        "out_channels": out_channels,
        "scaling_factor": 0.18215,
        "key": k_params,
        "i2v_processor": None,
    }
    ae = AEModel(config)

    latents, i2v_results = ae.encode(x)
    recon = ae.decode(latents)
    jax.block_until_ready((latents, recon))

    # --- pure-JAX reference using the SAME packed (folded, bf16) params ------
    def ref_conv_nhwc(x_nhwc, w9_bf16, b_pad, n_valid):
        Bb, Hh, Ww, Cc = x_nhwc.shape
        xpad = jnp.pad(x_nhwc.astype(jnp.bfloat16).astype(jnp.float32),
                       ((0, 0), (1, 1), (1, 1), (0, 0)))
        wf = w9_bf16.astype(jnp.float32)
        acc = jnp.zeros((Bb, Hh, Ww, wf.shape[-1]), jnp.float32)
        for t in range(9):
            di, dj = divmod(t, 3)
            acc = acc + jnp.einsum(
                "bhwc,cn->bhwn", xpad[:, di:di + Hh, dj:dj + Ww, :], wf[t],
                precision="highest")
        out = acc + b_pad.reshape(1, 1, 1, -1)
        # mirror the kernel's bf16 output quantization
        return out[..., :n_valid].astype(jnp.bfloat16).astype(jnp.float32)

    m = ae.get_model()
    x_nhwc = jnp.transpose(x, (0, 2, 3, 1))
    ref_lat = jnp.transpose(
        ref_conv_nhwc(x_nhwc, m.enc_w9, m.enc_bp, latent_channels), (0, 3, 1, 2))
    z_nhwc = jnp.transpose(latents, (0, 2, 3, 1))
    ref_rec = jnp.transpose(
        ref_conv_nhwc(z_nhwc, m.dec_w9, m.dec_bp, out_channels), (0, 3, 1, 2))

    lat_f32 = latents.astype(jnp.float32)
    rec_f32 = recon.astype(jnp.float32)

    assert latents.shape == (B, latent_channels, H, W)
    assert recon.shape == (B, out_channels, H, W)
    assert i2v_results is None
    assert jnp.allclose(lat_f32, ref_lat, atol=1e-2, rtol=1e-2), \
        float(jnp.max(jnp.abs(lat_f32 - ref_lat)))
    assert jnp.allclose(rec_f32, ref_rec, atol=1e-2, rtol=1e-2), \
        float(jnp.max(jnp.abs(rec_f32 - ref_rec)))

    # forward must raise, as in the reference module
    try:
        ae.forward(x)
        raise AssertionError("forward should have raised NotImplementedError")
    except NotImplementedError:
        pass

    print("KERNEL_OK")
</pallas_src>

<mosaic_0001>
module attributes {stable_mosaic.version = 11 : i64} {
  func.func @_conv3x3_kernel(%arg0: i32, %arg1: i32, %arg2: memref<1x456x4xbf16, #tpu.memory_space<vmem>>, %arg3: memref<9x4x128xbf16, #tpu.memory_space<vmem>>, %arg4: memref<1x128xf32, #tpu.memory_space<vmem>>, %arg5: memref<1x384x4xbf16, #tpu.memory_space<vmem>>) attributes {dimension_semantics = [#tpu.dimension_semantics<parallel>, #tpu.dimension_semantics<parallel>], iteration_bounds = array<i64: 2, 1>, scalar_prefetch = 0 : i64, scratch_operands = 0 : i64, tpu.core_type = #tpu.core_type<tc>, window_params = [{transform_indices = @transform_0, window_bounds = array<i64: 1, 456, 4>}, {pipeline_mode = #tpu.pipeline_mode<synchronous>, transform_indices = @transform_1, window_bounds = array<i64: 9, 4, 128>}, {pipeline_mode = #tpu.pipeline_mode<synchronous>, transform_indices = @transform_2, window_bounds = array<i64: 1, 128>}, {transform_indices = @transform_3, window_bounds = array<i64: 1, 384, 4>}]} {
    %c384_i32 = arith.constant 384 : i32
    %0 = arith.muli %arg1, %c384_i32 : i32
    %1 = tpu.assume_multiple %0, 384 : i32
    %c0 = arith.constant 0 : index
    %2 = arith.index_cast %1 : i32 to index
    %c0_0 = arith.constant 0 : index
    %3 = vector.load %arg2[%c0, %2, %c0_0] : memref<1x456x4xbf16, #tpu.memory_space<vmem>>, vector<1x448x4xbf16>
    %4 = vector.shape_cast %3 : vector<1x448x4xbf16> to vector<448x4xbf16>
    %c0_1 = arith.constant 0 : index
    %c0_2 = arith.constant 0 : index
    %5 = vector.load %arg4[%c0_1, %c0_2] : memref<1x128xf32, #tpu.memory_space<vmem>>, vector<1x128xf32>
    %6 = vector.shape_cast %5 : vector<1x128xf32> to vector<1x128xf32>
    %7 = vector.broadcast %6 : vector<1x128xf32> to vector<384x128xf32>
    %8 = vector.extract_strided_slice %4 {offsets = [0, 0], sizes = [432, 4], strides = [1, 1]} : vector<448x4xbf16> to vector<432x4xbf16>
    %9 = vector.extract_strided_slice %8 {offsets = [0, 0], sizes = [384, 4], strides = [1, 1]} : vector<432x4xbf16> to vector<384x4xbf16>
    %c0_3 = arith.constant 0 : index
    %c0_4 = arith.constant 0 : index
    %c0_5 = arith.constant 0 : index
    %10 = vector.load %arg3[%c0_3, %c0_4, %c0_5] : memref<9x4x128xbf16, #tpu.memory_space<vmem>>, vector<1x4x128xbf16>
    %11 = vector.shape_cast %10 : vector<1x4x128xbf16> to vector<4x128xbf16>
    %cst = arith.constant dense<0.000000e+00> : vector<384x128xf32>
    %12 = tpu.matmul %9, %11, %cst {dimension_numbers = #tpu.dot_dimension_numbers<[1], [0], [0], [1], [0, 0, 1, 1], [], []>} : vector<384x4xbf16>, vector<4x128xbf16>, vector<384x128xf32> -> vector<384x128xf32>
    %13 = arith.addf %7, %12 : vector<384x128xf32>
    %14 = vector.extract_strided_slice %8 {offsets = [24, 0], sizes = [384, 4], strides = [1, 1]} : vector<432x4xbf16> to vector<384x4xbf16>
    %c3 = arith.constant 3 : index
    %c0_6 = arith.constant 0 : index
    %c0_7 = arith.constant 0 : index
    %15 = vector.load %arg3[%c3, %c0_6, %c0_7] : memref<9x4x128xbf16, #tpu.memory_space<vmem>>, vector<1x4x128xbf16>
    %16 = vector.shape_cast %15 : vector<1x4x128xbf16> to vector<4x128xbf16>
    %cst_8 = arith.constant dense<0.000000e+00> : vector<384x128xf32>
    %17 = tpu.matmul %14, %16, %cst_8 {dimension_numbers = #tpu.dot_dimension_numbers<[1], [0], [0], [1], [0, 0, 1, 1], [], []>} : vector<384x4xbf16>, vector<4x128xbf16>, vector<384x128xf32> -> vector<384x128xf32>
    %18 = arith.addf %13, %17 : vector<384x128xf32>
    %19 = vector.extract_strided_slice %8 {offsets = [48, 0], sizes = [384, 4], strides = [1, 1]} : vector<432x4xbf16> to vector<384x4xbf16>
    %c6 = arith.constant 6 : index
    %c0_9 = arith.constant 0 : index
    %c0_10 = arith.constant 0 : index
    %20 = vector.load %arg3[%c6, %c0_9, %c0_10] : memref<9x4x128xbf16, #tpu.memory_space<vmem>>, vector<1x4x128xbf16>
    %21 = vector.shape_cast %20 : vector<1x4x128xbf16> to vector<4x128xbf16>
    %cst_11 = arith.constant dense<0.000000e+00> : vector<384x128xf32>
    %22 = tpu.matmul %19, %21, %cst_11 {dimension_numbers = #tpu.dot_dimension_numbers<[1], [0], [0], [1], [0, 0, 1, 1], [], []>} : vector<384x4xbf16>, vector<4x128xbf16>, vector<384x128xf32> -> vector<384x128xf32>
    %23 = arith.addf %18, %22 : vector<384x128xf32>
    %24 = vector.extract_strided_slice %4 {offsets = [1, 0], sizes = [432, 4], strides = [1, 1]} : vector<448x4xbf16> to vector<432x4xbf16>
    %25 = vector.extract_strided_slice %24 {offsets = [0, 0], sizes = [384, 4], strides = [1, 1]} : vector<432x4xbf16> to vector<384x4xbf16>
    %c1 = arith.constant 1 : index
    %c0_12 = arith.constant 0 : index
    %c0_13 = arith.constant 0 : index
    %26 = vector.load %arg3[%c1, %c0_12, %c0_13] : memref<9x4x128xbf16, #tpu.memory_space<vmem>>, vector<1x4x128xbf16>
    %27 = vector.shape_cast %26 : vector<1x4x128xbf16> to vector<4x128xbf16>
    %cst_14 = arith.constant dense<0.000000e+00> : vector<384x128xf32>
    %28 = tpu.matmul %25, %27, %cst_14 {dimension_numbers = #tpu.dot_dimension_numbers<[1], [0], [0], [1], [0, 0, 1, 1], [], []>} : vector<384x4xbf16>, vector<4x128xbf16>, vector<384x128xf32> -> vector<384x128xf32>
    %29 = arith.addf %23, %28 : vector<384x128xf32>
    %30 = vector.extract_strided_slice %24 {offsets = [24, 0], sizes = [384, 4], strides = [1, 1]} : vector<432x4xbf16> to vector<384x4xbf16>
    %c4 = arith.constant 4 : index
    %c0_15 = arith.constant 0 : index
    %c0_16 = arith.constant 0 : index
    %31 = vector.load %arg3[%c4, %c0_15, %c0_16] : memref<9x4x128xbf16, #tpu.memory_space<vmem>>, vector<1x4x128xbf16>
    %32 = vector.shape_cast %31 : vector<1x4x128xbf16> to vector<4x128xbf16>
    %cst_17 = arith.constant dense<0.000000e+00> : vector<384x128xf32>
    %33 = tpu.matmul %30, %32, %cst_17 {dimension_numbers = #tpu.dot_dimension_numbers<[1], [0], [0], [1], [0, 0, 1, 1], [], []>} : vector<384x4xbf16>, vector<4x128xbf16>, vector<384x128xf32> -> vector<384x128xf32>
    %34 = arith.addf %29, %33 : vector<384x128xf32>
    %35 = vector.extract_strided_slice %24 {offsets = [48, 0], sizes = [384, 4], strides = [1, 1]} : vector<432x4xbf16> to vector<384x4xbf16>
    %c7 = arith.constant 7 : index
    %c0_18 = arith.constant 0 : index
    %c0_19 = arith.constant 0 : index
    %36 = vector.load %arg3[%c7, %c0_18, %c0_19] : memref<9x4x128xbf16, #tpu.memory_space<vmem>>, vector<1x4x128xbf16>
    %37 = vector.shape_cast %36 : vector<1x4x128xbf16> to vector<4x128xbf16>
    %cst_20 = arith.constant dense<0.000000e+00> : vector<384x128xf32>
    %38 = tpu.matmul %35, %37, %cst_20 {dimension_numbers = #tpu.dot_dimension_numbers<[1], [0], [0], [1], [0, 0, 1, 1], [], []>} : vector<384x4xbf16>, vector<4x128xbf16>, vector<384x128xf32> -> vector<384x128xf32>
    %39 = arith.addf %34, %38 : vector<384x128xf32>
    %40 = vector.extract_strided_slice %4 {offsets = [2, 0], sizes = [432, 4], strides = [1, 1]} : vector<448x4xbf16> to vector<432x4xbf16>
    %41 = vector.extract_strided_slice %40 {offsets = [0, 0], sizes = [384, 4], strides = [1, 1]} : vector<432x4xbf16> to vector<384x4xbf16>
    %c2 = arith.constant 2 : index
    %c0_21 = arith.constant 0 : index
    %c0_22 = arith.constant 0 : index
    %42 = vector.load %arg3[%c2, %c0_21, %c0_22] : memref<9x4x128xbf16, #tpu.memory_space<vmem>>, vector<1x4x128xbf16>
    %43 = vector.shape_cast %42 : vector<1x4x128xbf16> to vector<4x128xbf16>
    %cst_23 = arith.constant dense<0.000000e+00> : vector<384x128xf32>
    %44 = tpu.matmul %41, %43, %cst_23 {dimension_numbers = #tpu.dot_dimension_numbers<[1], [0], [0], [1], [0, 0, 1, 1], [], []>} : vector<384x4xbf16>, vector<4x128xbf16>, vector<384x128xf32> -> vector<384x128xf32>
    %45 = arith.addf %39, %44 : vector<384x128xf32>
    %46 = vector.extract_strided_slice %40 {offsets = [24, 0], sizes = [384, 4], strides = [1, 1]} : vector<432x4xbf16> to vector<384x4xbf16>
    %c5 = arith.constant 5 : index
    %c0_24 = arith.constant 0 : index
    %c0_25 = arith.constant 0 : index
    %47 = vector.load %arg3[%c5, %c0_24, %c0_25] : memref<9x4x128xbf16, #tpu.memory_space<vmem>>, vector<1x4x128xbf16>
    %48 = vector.shape_cast %47 : vector<1x4x128xbf16> to vector<4x128xbf16>
    %cst_26 = arith.constant dense<0.000000e+00> : vector<384x128xf32>
    %49 = tpu.matmul %46, %48, %cst_26 {dimension_numbers = #tpu.dot_dimension_numbers<[1], [0], [0], [1], [0, 0, 1, 1], [], []>} : vector<384x4xbf16>, vector<4x128xbf16>, vector<384x128xf32> -> vector<384x128xf32>
    %50 = arith.addf %45, %49 : vector<384x128xf32>
    %51 = vector.extract_strided_slice %40 {offsets = [48, 0], sizes = [384, 4], strides = [1, 1]} : vector<432x4xbf16> to vector<384x4xbf16>
    %c8 = arith.constant 8 : index
    %c0_27 = arith.constant 0 : index
    %c0_28 = arith.constant 0 : index
    %52 = vector.load %arg3[%c8, %c0_27, %c0_28] : memref<9x4x128xbf16, #tpu.memory_space<vmem>>, vector<1x4x128xbf16>
    %53 = vector.shape_cast %52 : vector<1x4x128xbf16> to vector<4x128xbf16>
    %cst_29 = arith.constant dense<0.000000e+00> : vector<384x128xf32>
    %54 = tpu.matmul %51, %53, %cst_29 {dimension_numbers = #tpu.dot_dimension_numbers<[1], [0], [0], [1], [0, 0, 1, 1], [], []>} : vector<384x4xbf16>, vector<4x128xbf16>, vector<384x128xf32> -> vector<384x128xf32>
    %55 = arith.addf %50, %54 : vector<384x128xf32>
    %56 = vector.extract_strided_slice %55 {offsets = [0, 0], sizes = [384, 4], strides = [1, 1]} : vector<384x128xf32> to vector<384x4xf32>
    %57 = arith.truncf %56 : vector<384x4xf32> to vector<384x4xbf16>
    %c0_30 = arith.constant 0 : index
    %c0_31 = arith.constant 0 : index
    %c0_32 = arith.constant 0 : index
    %58 = vector.load %arg5[%c0_30, %c0_31, %c0_32] : memref<1x384x4xbf16, #tpu.memory_space<vmem>>, vector<1x384x4xbf16>
    %59 = vector.shape_cast %58 : vector<1x384x4xbf16> to vector<384x4xbf16>
    %60 = vector.shape_cast %57 : vector<384x4xbf16> to vector<1x384x4xbf16>
    tpu.vector_store %arg5[%c0_30, %c0_31, %c0_32], %60 {strides = array<i32>} : memref<1x384x4xbf16, #tpu.memory_space<vmem>>, vector<1x384x4xbf16>,
    return
  }
  func.func @transform_0(%arg0: i32, %arg1: i32) -> (i32, i32, i32) {
    %c0_i32 = arith.constant 0 : i32
    %c0_i32_0 = arith.constant 0 : i32
    %c0_i32_1 = arith.constant 0 : i32
    return %arg0, %c0_i32, %c0_i32_0 : i32, i32, i32
  }
  func.func @transform_1(%arg0: i32, %arg1: i32) -> (i32, i32, i32) {
    %c0_i32 = arith.constant 0 : i32
    %c0_i32_0 = arith.constant 0 : i32
    %c0_i32_1 = arith.constant 0 : i32
    %c0_i32_2 = arith.constant 0 : i32
    return %c0_i32, %c0_i32_0, %c0_i32_1 : i32, i32, i32
  }
  func.func @transform_2(%arg0: i32, %arg1: i32) -> (i32, i32) {
    %c0_i32 = arith.constant 0 : i32
    %c0_i32_0 = arith.constant 0 : i32
    %c0_i32_1 = arith.constant 0 : i32
    return %c0_i32, %c0_i32_0 : i32, i32
  }
  func.func @transform_3(%arg0: i32, %arg1: i32) -> (i32, i32, i32) {
    %c0_i32 = arith.constant 0 : i32
    %c0_i32_0 = arith.constant 0 : i32
    return %arg0, %arg1, %c0_i32 : i32, i32, i32
  }
}

</mosaic_0001>

<bundles_post_ra>
// kernel: tpu_custom_call.1
= control target key start
LH: loop header
LB: loop body
LE: loop exit
PB: predicated region body
PF: predicated region fallthrough
CT: control target
= control target key end

     0   :  { %s5824_s12 = smov 0   ;;  %s5826_s13 = smov 0   ;;  %s7039_s0 = inlined_call_operand.vmem [shape: bf16[2,456,4], index: 0, kind: input, shape index: {}]   ;;  %s7040_s1 = inlined_call_operand.vmem [shape: bf16[9,4,128], index: 1, kind: input, shape index: {}]   ;;  %s7041_s2 = inlined_call_operand.vmem [shape: f32[1,128], index: 2, kind: input, shape index: {}]   ;;  %s7042_s3 = inlined_call_operand.vmem [shape: bf16[2,384,4], index: 3, kind: output, shape index: {}]  }
   0x1   :  { %s5828_s14 = smov 0  }
   0x2 LB: > { %s25_s15 = sadd.s32 1, %s5798_s13  ;;  %p4200_p0 = scmp.ge.s32.totalorder %s5802_s14, 1  ;;  %s5802_s14 = sphi %s5828_s14, %s13_s14   ;;  %s5798_s13 = sphi %s5826_s13, %s7157_s13   ;;  %s5794_s12 = sphi %s5824_s12, %s7156_s12  }
   0x3   : > { %p27_p1 = scmp.ge.s32.totalorder %s25_s15, 2  ;;  %p151_p2 = scmp.lt.s32.totalorder %s5802_s14, 3 }
   0x5   : > { %s7159_s15 = smov (%p27_p1, %s25_s15), 0  ;;  %p152_p3 = pnand %p4200_p0, %p151_p2 }
   0x7   : > { %155 = sbr.rel (%p152_p3) target bundleno = 676 (0x2a4), region = 32 }
   0xe   : > { %v262_v0 = vld [vmem:[%s7040_s1] sm:$0x3]  ;;  %vm456_vm0 = vcmask 1041408   ;;  %p179_p4 = scmp.lt.s32.totalorder %s5794_s12, 1  ;;  %v5850_v2 = vld [vmem:[%s7040_s1 + $0x8] sm:$0x3] }
   0xf   : > { %5689 = vmatprep.subr.msk.bf16.mxu1 %vm456_vm0, %v262_v0  ;;  %v458_v1 = vsel %vm456_vm0, %v262_v0, 0  ;;  %7082 = vst [vmem:[#allocation2_spill] sm:$0xff] %v5850_v2  ;;  %v4252_v3 = vld [vmem:[%s7040_s1 + $0x6] sm:$0x3]  ;;  %5693 = vmatprep.subr.msk.bf16.mxu0 %vm456_vm0, %v5850_v2  ;;  %v5861_v4 = vsel %vm456_vm0, %v5850_v2, 0  ;;  %vm383_vm1 = vcmask 31744  }
  0x10   : > { %4806 = vmatpush3.bf16.msra.mxu1 %v458_v1  ;;  %s7161_s12 = smov (!%p179_p4, %s5794_s12), 1  ;;  %7083 = vst [vmem:[#allocation3_spill] sm:$0xff] %v5861_v4  ;;  %5006 = vmatpush3.bf16.msra.mxu0 %v5861_v4  ;;  %v4381_v5 = vld [vmem:[%s7040_s1 + $0xe] sm:$0x3]  ;;  %v838_v7 = vsel %vm456_vm0, %v4252_v3, 0  ;;  %vm2777_vm3 = vcmask 1046528  }
  0x11   : > { %5690 = vmatprep.subr.msk.bf16.mxu1 %vm456_vm0, %v4252_v3  ;;  %s5699_s24 = smul.u32 228, %s7161_s12  ;;  %5695 = vmatprep.subr.msk.bf16.mxu0 %vm456_vm0, %v4381_v5  ;;  %v5885_v11 = vld [vmem:[%s7040_s1 + $0xc] sm:$0x3]  ;;  %vm1412_vm2 = vsmask.f32 7424  ;;  %v2500_v45 = vsel %vm456_vm0, %v4381_v5, 0 }
  0x12   : > { %v5956_v60 = vld [vmem:[%s7040_s1 + $0x4] sm:$0x3]  ;;  %s5700_s17 = smul.u32 192, %s7161_s12  ;;  %vm4064_vm4 = vcmask 27648  }
  0x13   : > { %s5873_s27 = scalar_lea.vmem %s7039_s0, %s5699_s24 }
  0x14   : > { %v5876_v6 = vld [vmem:[%s5873_s27] sm:$0xff]   ;;  %v202_v8 = vld [vmem:[%s5873_s27 + $0x8] sm:$0xf]  ;;  %v203_v9 = vld [vmem:[%s5873_s27 + $0xc] sm:$0xf]  ;;  %s6875_s20 = scalar_lea.vmem %s7042_s3, %s5700_s17 }
  0x15   : > { %v204_v10 = vld [vmem:[%s5873_s27 + $0x10] sm:$0xf]  ;;  %4807 = vmatprep.mubr.msk.bf16.mxu1 %vm383_vm1, %v5876_v6  ;;  %v5889_v12 = vcombine.low %v202_v8, %v203_v9  ;;  %v205_v14 = vld [vmem:[%s5873_s27 + $0x14] sm:$0xf]  ;;  %v206_v15 = vld [vmem:[%s5873_s27 + $0x18] sm:$0xf] }
  0x16   : > { %v5891_v13 = vcombine.low %v203_v9, %v204_v10  ;;  %v207_v16 = vld [vmem:[%s5873_s27 + $0x1c] sm:$0xf]  ;;  %v5896_v17 = vcombine.low %v205_v14, %v206_v15  ;;  %v5898_v18 = vcombine.low %v204_v10, %v205_v14  ;;  %v208_v19 = vld [vmem:[%s5873_s27 + $0x20] sm:$0xf]  ;;  %v209_v20 = vld [vmem:[%s5873_s27 + $0x24] sm:$0xf] }
  0x17   : > { %v210_v21 = vld [vmem:[%s5873_s27 + $0x28] sm:$0xf]  ;;  %4808 = vmatmul.mubr.msk.bf16.vlgmr.msra.gmra.mrb[0].mxu1 %vm383_vm1, %v5889_v12  ;;  %v5907_v24 = vcombine.low %v207_v16, %v208_v19  ;;  %v211_v26 = vld [vmem:[%s5873_s27 + $0x2c] sm:$0xf]  ;;  %v212_v27 = vld [vmem:[%s5873_s27 + $0x30] sm:$0xf]  ;;  %v5928_v38 = vcombine.low %v206_v15, %v207_v16  ;;  %v5935_v46 = vcombine.low %v208_v19, %v209_v20 }
  0x18   : > { %v1936_v22 = vshrl.u32 %v5891_v13, 16  ;;  %v1938_v23 = vshll.u32 %v5891_v13, 16  ;;  %v5909_v25 = vcombine.low %v209_v20, %v210_v21  ;;  %4856 = vmatpush3.bf16.msra.mxu1 %v838_v7  ;;  %v1942_v28 = vshll.u32 %v5896_v17, 16  ;;  %4811 = vmatprep.mubr.msk.bf16.mxu1 %vm383_vm1, %v5898_v18  ;;  %v213_v31 = vld [vmem:[%s5873_s27 + $0x34] sm:$0xf] }
  0x19   : > { %v1946_v29 = vshrl.u32 %v5896_v17, 16  ;;  %v5917_v30 = vcombine.low %v211_v26, %v212_v27  ;;  %v5921_v32 = vld [vmem:[%s5873_s27 + $0x38] sm:$0xf]  ;;  %v1949_v34 = vshll.u32 %v5907_v24, 16  ;;  %v1953_v35 = vshrl.u32 %v5907_v24, 16  ;;  %5691 = vmatprep.subr.msk.bf16.mxu1 %vm456_vm0, %v5885_v11 }
  0x1a   : > { %v1940_v33 = vrot.slane %v1938_v23, 1  ;;  %v1956_v36 = vshll.u32 %v5909_v25, 16  ;;  %v1944_v37 = vrot.slane %v1942_v28, 1  ;;  %v5932_v43 = vcombine.low %v213_v31, %v5921_v32  ;;  %v215_v48 = vld [vmem:[%s5873_s27 + $0x3c] sm:$0xf] }
  0x1b   : > { %v1963_v39 = vshll.u32 %v5917_v30, 16  ;;  %v1951_v41 = vrot.slane %v1949_v34, 1  ;;  %v1960_v47 = vshrl.u32 %v5909_v25, 16  ;;  %v216_v49 = vld [vmem:[%s5873_s27 + $0x40] sm:$0xf]  ;;  %v1967_v52 = vshrl.u32 %v5917_v30, 16 }
  0x1c   : > { %v1941_v40 = vor.u32 %v1940_v33, %v1936_v22  ;;  %v1958_v42 = vrot.slane %v1956_v36, 1  ;;  %v1948_v44 = vor.u32 %v1946_v29, %v1944_v37  ;;  %v1970_v53 = vshll.u32 %v5932_v43, 16  ;;  %v217_v55 = vld [vmem:[%s5873_s27 + $0x44] sm:$0xf]  ;;  %v218_v56 = vld [vmem:[%s5873_s27 + $0x48] sm:$0xf] }
  0x1d   : > { %v1955_v51 = vor.u32 %v1953_v35, %v1951_v41  ;;  %v1965_v58 = vrot.slane %v1963_v39, 1  ;;  %v5951_v59 = vcombine.low %v215_v48, %v216_v49  ;;  %v5961_v0 = vcombine.low %v217_v55, %v218_v56  ;;  %v219_v9 = vld [vmem:[%s5873_s27 + $0x4c] sm:$0xf]  ;;  %v220_v10 = vld [vmem:[%s5873_s27 + $0x50] sm:$0xf] }
  0x1e   : > { %v1945_v50 = vsel %vm1412_vm2, %v1941_v40, %v1944_v37  ;;  %v1952_v54 = vsel %vm1412_vm2, %v1948_v44, %v1951_v41  ;;  %v1962_v61 = vor.u32 %v1960_v47, %v1958_v42  ;;  %v1972_v63 = vrot.slane %v1970_v53, 1  ;;  %v221_v19 = vld [vmem:[%s5873_s27 + $0x54] sm:$0xf]  ;;  %v222_v20 = vld [vmem:[%s5873_s27 + $0x58] sm:$0xf] }
  0x1f   : > { %5007 = vmatprep.mubr.msk.bf16.mxu0 %vm383_vm1, %v1945_v50  ;;  %4812 = vmatmul.mubr.msk.bf16.gmra.mrb[4].mxu1 %vm383_vm1, %v5928_v38  ;;  %v1959_v57 = vsel %vm1412_vm2, %v1955_v51, %v1958_v42  ;;  %v1969_v62 = vor.u32 %v1967_v52, %v1965_v58  ;;  %v5965_v1 = vcombine.low %v210_v21, %v211_v26  ;;  %v1977_v3 = vshll.u32 %v5951_v59, 16  ;;  %v223_v36 = vld [vmem:[%s5873_s27 + $0x5c] sm:$0xf]  ;;  %v224_v37 = vld [vmem:[%s5873_s27 + $0x60] sm:$0xf] }
  0x20   : > { %5008 = vmatmul.mubr.msk.bf16.vlgmr.msra.gmra.mrb[0].mxu0 %vm383_vm1, %v1952_v54  ;;  %4815 = vmatprep.mubr.msk.bf16.mxu1 %vm383_vm1, %v5935_v46  ;;  %v1966_v5 = vsel %vm1412_vm2, %v1962_v61, %v1965_v58  ;;  %v5969_v7 = vcombine.low %v212_v27, %v213_v31  ;;  %v1974_v8 = vshrl.u32 %v5932_v43, 16  ;;  %v1981_v15 = vshrl.u32 %v5951_v59, 16  ;;  %v225_v42 = vld [vmem:[%s5873_s27 + $0x64] sm:$0xf]  ;;  %v226_v44 = vld [vmem:[%s5873_s27 + $0x68] sm:$0xf] }
  0x21   : > { %5056 = vmatpush3.bf16.msra.mxu0 %v2500_v45  ;;  %5011 = vmatprep.mubr.msk.bf16.mxu0 %vm383_vm1, %v1959_v57  ;;  %v1973_v14 = vsel %vm1412_vm2, %v1969_v62, %v1972_v63  ;;  %v1984_v16 = vshll.u32 %v5961_v0, 16  ;;  %v1979_v21 = vrot.slane %v1977_v3, 1  ;;  %v5982_v22 = vcombine.low %v219_v9, %v220_v10  ;;  %v227_v62 = vld [vmem:[%s5873_s27 + $0x6c] sm:$0xf]  ;;  %v247_v4 = vld [vmem:[%s5873_s27 + $0xbc] sm:$0xf] }
  0x22   : > { %5696 = vmatprep.subr.msk.bf16.mxu0 %vm456_vm0, %v5956_v60  ;;  %v1976_v23 = vor.u32 %v1974_v8, %v1972_v63  ;;  %v5987_v28 = vcombine.low %v221_v19, %v222_v20  ;;  %v5990_v29 = vcombine.low %v5921_v32, %v215_v48  ;;  %v5994_v34 = vcombine.low %v216_v49, %v217_v55  ;;  %v228_v63 = vld [vmem:[%s5873_s27 + $0x70] sm:$0xf] }
  0x23   : > { %v1983_v26 = vor.u32 %v1981_v15, %v1979_v21  ;;  %v1986_v27 = vrot.slane %v1984_v16, 1  ;;  %v1991_v31 = vshll.u32 %v5982_v22, 16  ;;  %v1988_v35 = vshrl.u32 %v5961_v0, 16 }
  0x24   : > { %7084 = vst [vmem:[#allocation4_spill] sm:$0xff] %v5990_v29  ;;  %v1980_v33 = vsel %vm1412_vm2, %v1976_v23, %v1979_v21  ;;  %v1995_v40 = vshrl.u32 %v5982_v22, 16  ;;  %v1998_v41 = vshll.u32 %v5987_v28, 16  ;;  %v6007_v45 = vcombine.low %v223_v36, %v224_v37 }
  0x25   : > { %v1987_v39 = vsel %vm1412_vm2, %v1983_v26, %v1986_v27  ;;  %v1993_v32 = vrot.slane %v1991_v31, 1  ;;  %v1990_v47 = vor.u32 %v1988_v35, %v1986_v27  ;;  %v6012_v50 = vcombine.low %v225_v42, %v226_v44 }
  0x26   : > { %v2000_v49 = vrot.slane %v1998_v41, 1  ;;  %v6014_v51 = vcombine.low %v218_v56, %v219_v9  ;;  %v2005_v52 = vshll.u32 %v6007_v45, 16  ;;  %v6018_v54 = vcombine.low %v220_v10, %v221_v19 }
  0x27   : > { %4816 = vmatmul.mubr.msk.bf16.gmra.mrb[8].mxu1 %vm383_vm1, %v5965_v1  ;;  %v1997_v48 = vor.u32 %v1995_v40, %v1993_v32  ;;  %v1994_v53 = vsel %vm1412_vm2, %v1990_v47, %v1993_v32  ;;  %v2002_v55 = vshrl.u32 %v5987_v28, 16  ;;  %v2009_v58 = vshrl.u32 %v6007_v45, 16 }
  0x28   : > { %5012 = vmatmul.mubr.msk.bf16.gmra.mrb[4].mxu0 %vm383_vm1, %v1966_v5  ;;  %4819 = vmatprep.mubr.msk.bf16.mxu1 %vm383_vm1, %v5969_v7  ;;  %7085 = vst [vmem:[#allocation5_spill] sm:$0xff] %v6014_v51  ;;  %v2012_v61 = vshll.u32 %v6012_v50, 16  ;;  %v2007_v56 = vrot.slane %v2005_v52, 1  ;;  %v6032_v5 = vcombine.low %v227_v62, %v228_v63  ;;  %v1433_v10 = vshll.u32 %v5928_v38, 16 }
  0x29   : > { %5015 = vmatprep.mubr.msk.bf16.mxu0 %vm383_vm1, %v1973_v14  ;;  %v2001_v57 = vsel %vm1412_vm2, %v1997_v48, %v2000_v49  ;;  %v2004_v3 = vor.u32 %v2002_v55, %v2000_v49  ;;  %v6035_v14 = vcombine.low %v222_v20, %v223_v36  ;;  %v6038_v16 = vcombine.low %v224_v37, %v225_v42  ;;  %v229_v37 = vld [vmem:[%s5873_s27 + $0x74] sm:$0xf]  ;;  %v231_v55 = vld [vmem:[%s5873_s27 + $0x7c] sm:$0xf] }
  0x2a   : > { %v2011_v8 = vor.u32 %v2009_v58, %v2007_v56  ;;  %v2014_v9 = vrot.slane %v2012_v61, 1  ;;  %v2016_v19 = vshrl.u32 %v6012_v50, 16  ;;  %v2019_v21 = vshll.u32 %v6032_v5, 16  ;;  %v232_v61 = vld [vmem:[%s5873_s27 + $0x80] sm:$0xf] }
  0x2b   : > { %v2008_v15 = vsel %vm1412_vm2, %v2004_v3, %v2007_v56  ;;  %v6043_v26 = vrot.slane %v1433_v10, 1  ;;  %v1437_v27 = vshrl.u32 %v5928_v38, 16  ;;  %v1440_v31 = vshll.u32 %v5935_v46, 16 }
  0x2c   : > { %v2015_v23 = vsel %vm1412_vm2, %v2011_v8, %v2014_v9  ;;  %v2018_v20 = vor.u32 %v2016_v19, %v2014_v9  ;;  %v1447_v40 = vshll.u32 %v5965_v1, 16  ;;  %v1444_v42 = vshrl.u32 %v5935_v46, 16 }
  0x2d   : > { %7086 = vst [vmem:[#allocation6_spill] sm:$0xff] %v6043_v26  ;;  %v1439_v35 = vor.u32 %v1437_v27, %v6043_v26  ;;  %v1442_v36 = vrot.slane %v1440_v31, 1  ;;  %v6063_v32 = vcombine.low %v228_v63, %v229_v37  ;;  %v1451_v48 = vshrl.u32 %v5965_v1, 16 }
  0x2e   : > { %v1454_v49 = vshll.u32 %v5969_v7, 16  ;;  %v1461_v56 = vshll.u32 %v5990_v29, 16  ;;  %v2900_v9 = vsel %vm456_vm0, %v5956_v60, 0  ;;  %v1465_v27 = vshrl.u32 %v5990_v29, 16  ;;  %v236_v60 = vld [vmem:[%s5873_s27 + $0x90] sm:$0xf] }
  0x2f   : > { %4820 = vmatmul.mubr.msk.bf16.gmra.mrb[12].mxu1 %vm383_vm1, %v5990_v29  ;;  %v6066_v47 = vsel %vm1412_vm2, %v1439_v35, %v1442_v36  ;;  %v1446_v52 = vor.u32 %v1444_v42, %v1442_v36  ;;  %v1468_v31 = vshll.u32 %v5994_v34, 16  ;;  %v237_v35 = vld [vmem:[%s5873_s27 + $0x94] sm:$0xf]  ;;  %v6108_v36 = vld [vmem:[%s7040_s1 + $0xa] sm:$0x3] }
  0x30   : > { %5016 = vmatmul.mubr.msk.bf16.gmra.mrb[8].mxu0 %vm383_vm1, %v1980_v33  ;;  %4823 = vmatprep.mubr.msk.bf16.mxu1 %vm383_vm1, %v5994_v34  ;;  %v6053_v33 = vrot.slane %v2019_v21, 1  ;;  %7088 = vst [vmem:[#allocation8_spill] sm:$0xff] %v6066_v47  ;;  %v1456_v58 = vrot.slane %v1454_v49, 1  ;;  %v234_v21 = vld [vmem:[%s5873_s27 + $0x88] sm:$0xf]  ;;  %v6153_v2 = vcombine.low %v236_v60, %v237_v35 }
  0x31   : > { %5019 = vmatprep.mubr.msk.bf16.mxu0 %vm383_vm1, %v1987_v39  ;;  %v6057_v39 = vcombine.low %v226_v44, %v227_v62  ;;  %v1449_v44 = vrot.slane %v1447_v40, 1  ;;  %v233_v62 = vld [vmem:[%s5873_s27 + $0x84] sm:$0xf]  ;;  %v1463_v40 = vrot.slane %v1461_v56, 1  ;;  %v239_v42 = vld [vmem:[%s5873_s27 + $0x9c] sm:$0xf] }
  0x32   : > { %7087 = vst [vmem:[#allocation7_spill] sm:$0xff] %v6053_v33  ;;  %v2022_v41 = vsel %vm1412_vm2, %v2018_v20, %v6053_v33  ;;  %v6091_v10 = vcombine.low %v232_v61, %v233_v62  ;;  %v6101_v20 = vcombine.low %v231_v55, %v232_v61  ;;  %v1470_v61 = vrot.slane %v1468_v31, 1  ;;  %v244_v56 = vld [vmem:[%s5873_s27 + $0xb0] sm:$0xf]  ;;  %v246_v33 = vld [vmem:[%s5873_s27 + $0xb8] sm:$0xf] }
  0x33   : > { %v6087_v8 = vsel %vm1412_vm2, %v1446_v52, %v1449_v44  ;;  %v241_v52 = vld [vmem:[%s5873_s27 + $0xa4] sm:$0xf] }
  0x34   : > { %7089 = vst [vmem:[#allocation9_spill] sm:$0xff] %v6087_v8 }
  0x37   : > { %4824 = vmatmul.mubr.msk.bf16.gmra.mrb[16].mxu1 %vm383_vm1, %v6014_v51 }
  0x38   : > { %5020 = vmatmul.mubr.msk.bf16.gmra.mrb[12].mxu0 %vm383_vm1, %v1994_v53  ;;  %4827 = vmatprep.mubr.msk.bf16.mxu1 %vm383_vm1, %v6018_v54  ;;  %v230_v53 = vld [vmem:[%s5873_s27 + $0x78] sm:$0xf] }
  0x39   : > { %5023 = vmatprep.mubr.msk.bf16.mxu0 %vm383_vm1, %v2001_v57  ;;  %v1453_v57 = vor.u32 %v1451_v48, %v1449_v44  ;;  %v6081_v63 = vcombine.low %v230_v53, %v231_v55  ;;  %v6084_v3 = vcombine.low %v229_v37, %v230_v53  ;;  %v6110_v37 = vcombine.low %v233_v62, %v234_v21  ;;  %v240_v44 = vld [vmem:[%s5873_s27 + $0xa0] sm:$0xf]  ;;  %v242_v53 = vld [vmem:[%s5873_s27 + $0xa8] sm:$0xf]  ;;  %v243_v62 = vld [vmem:[%s5873_s27 + $0xac] sm:$0xf] }
  0x3b   : > { %v6095_v19 = vsel %vm1412_vm2, %v1453_v57, %v1456_v58  ;;  %v1467_v57 = vor.u32 %v1465_v27, %v1463_v40  ;;  %v6146_v27 = vld [vmem:[%s5873_s27 + $0xc0] sm:$0xf] }
  0x3c   : > { %7090 = vst [vmem:[#allocation10_spill] sm:$0xff] %v6095_v19  ;;  %v6157_v29 = vcombine.low %v247_v4, %v6146_v27 }
  0x3e   : > { %7095 = vst [vmem:[#allocation15_spill] sm:$0xff] %v6157_v29  ;;  %v1489_v29 = vshll.u32 %v6035_v14, 16 }
  0x3f   : > { %4828 = vmatmul.mubr.msk.bf16.gmra.mrb[20].mxu1 %vm383_vm1, %v6035_v14 }
  0x40   : > { %5024 = vmatmul.mubr.msk.bf16.gmra.mrb[16].mxu0 %vm383_vm1, %v2008_v15  ;;  %4831 = vmatprep.mubr.msk.bf16.mxu1 %vm383_vm1, %v6038_v16  ;;  %v1458_v15 = vshrl.u32 %v5969_v7, 16 }
  0x41   : > { %5027 = vmatprep.mubr.msk.bf16.mxu0 %vm383_vm1, %v2015_v23  ;;  %v235_v23 = vld [vmem:[%s5873_s27 + $0x8c] sm:$0xf] }
  0x42   : > { %v6118_v48 = vcombine.low %v235_v23, %v236_v60  ;;  %v1460_v49 = vor.u32 %v1458_v15, %v1456_v58  ;;  %v6135_v58 = vcombine.low %v241_v52, %v242_v53  ;;  %v245_v15 = vld [vmem:[%s5873_s27 + $0xb4] sm:$0xf] }
  0x43   : > { %v6148_v31 = vcombine.low %v245_v15, %v246_v33 }
  0x44   : > { %7091 = vst [vmem:[#allocation11_spill] sm:$0xff] %v6135_v58  ;;  %v6151_v26 = vsel %vm1412_vm2, %v1460_v49, %v1463_v40  ;;  %v1472_v58 = vshrl.u32 %v5994_v34, 16 }
  0x45   : > { %7093 = vst [vmem:[#allocation13_spill] sm:$0xff] %v6148_v31  ;;  %7094 = vst [vmem:[#allocation14_spill] sm:$0xff] %v6151_v26 }
  0x47   : > { %4832 = vmatmul.mubr.msk.bf16.gmra.mrb[24].mxu1 %vm383_vm1, %v6057_v39 }
  0x48   : > { %5028 = vmatmul.mubr.msk.bf16.gmra.mrb[20].mxu0 %vm383_vm1, %v2022_v41  ;;  %4835 = vmatprep.mubr.msk.bf16.mxu1 %vm383_vm1, %v6063_v32  ;;  %v238_v41 = vld [vmem:[%s5873_s27 + $0x98] sm:$0xf] }
  0x49   : > { %5057 = vmatprep.mubr.msk.bf16.mxu0 %vm383_vm1, %v6066_v47  ;;  %v6125_v55 = vcombine.low %v237_v35, %v238_v41  ;;  %v1475_v47 = vshll.u32 %v6014_v51, 16  ;;  %v1474_v35 = vor.u32 %v1472_v58, %v1470_v61  ;;  %v1503_v58 = vshll.u32 %v6057_v39, 16 }
  0x4b   : > { %v1477_v60 = vrot.slane %v1475_v47, 1  ;;  %v1486_v47 = vshrl.u32 %v6018_v54, 16 }
  0x4d   : > { %v6176_v31 = vsel %vm1412_vm2, %v1474_v35, %v1477_v60 }
  0x4e   : > { %7097 = vst [vmem:[#allocation17_spill] sm:$0xff] %v6176_v31 }
  0x4f   : > { %4836 = vmatmul.mubr.msk.bf16.gmra.mrb[28].mxu1 %vm383_vm1, %v6081_v63 }
  0x50   : > { %5058 = vmatmul.mubr.msk.bf16.vlgmr.msra.gmra.mrb[0].mxu0 %vm383_vm1, %v6087_v8  ;;  %4839 = vmatprep.mubr.msk.bf16.mxu1 %vm383_vm1, %v6091_v10  ;;  %v6141_v8 = vcombine.low %v234_v21, %v235_v23  ;;  %v6160_v21 = vsel %vm1412_vm2, %v1467_v57, %v1470_v61  ;;  %v1479_v23 = vshrl.u32 %v6014_v51, 16  ;;  %v6172_v57 = vcombine.low %v238_v41, %v239_v42 }
  0x51   : > { %5106 = vmatpush3.bf16.msra.mxu0 %v2900_v9  ;;  %5061 = vmatprep.mubr.msk.bf16.mxu0 %vm383_vm1, %v6095_v19  ;;  %v6133_v9 = vcombine.low %v239_v42, %v240_v44  ;;  %v6139_v19 = vcombine.low %v243_v62, %v244_v56  ;;  %7096 = vst [vmem:[#allocation16_spill] sm:$0xff] %v6160_v21  ;;  %v1496_v61 = vshll.u32 %v6038_v16, 16 }
  0x52   : > { %5697 = vmatprep.subr.msk.bf16.mxu0 %vm456_vm0, %v6108_v36  ;;  %v1481_v40 = vor.u32 %v1479_v23, %v1477_v60  ;;  %v6200_v60 = vcombine.low %v244_v56, %v245_v15 }
  0x53   : > { %7092 = vst [vmem:[#allocation12_spill] sm:$0xff] %v6139_v19  ;;  %v1482_v19 = vshll.u32 %v6018_v54, 16 }
  0x55   : > { %v1484_v49 = vrot.slane %v1482_v19, 1  ;;  %v1491_v19 = vrot.slane %v1489_v29, 1  ;;  %v1500_v29 = vshrl.u32 %v6038_v16, 16 }
  0x57   : > { %4840 = vmatmul.mubr.msk.bf16.gmra.mrb[32].mxu1 %vm383_vm1, %v6141_v8  ;;  %v6182_v51 = vsel %vm1412_vm2, %v1481_v40, %v1484_v49  ;;  %v1488_v41 = vor.u32 %v1486_v47, %v1484_v49  ;;  %v1507_v40 = vshrl.u32 %v6057_v39, 16  ;;  %v1510_v49 = vshll.u32 %v6063_v32, 16 }
  0x58   : > { %5062 = vmatmul.mubr.msk.bf16.gmra.mrb[4].mxu0 %vm383_vm1, %v6151_v26  ;;  %4843 = vmatprep.mubr.msk.bf16.mxu1 %vm383_vm1, %v6153_v2  ;;  %v6178_v26 = vcombine.low %v240_v44, %v241_v52  ;;  %7098 = vst [vmem:[#allocation18_spill] sm:$0xff] %v6182_v51  ;;  %v1498_v44 = vrot.slane %v1496_v61, 1  ;;  %v6194_v52 = vcombine.low %v242_v53, %v243_v62  ;;  %v1505_v53 = vrot.slane %v1503_v58, 1 }
  0x59   : > { %5065 = vmatprep.mubr.msk.bf16.mxu0 %vm383_vm1, %v6160_v21  ;;  %v1493_v21 = vshrl.u32 %v6035_v14, 16  ;;  %v6198_v23 = vsel %vm1412_vm2, %v1488_v41, %v1491_v19  ;;  %v1512_v15 = vrot.slane %v1510_v49, 1  ;;  %v1517_v47 = vshll.u32 %v6081_v63, 16 }
  0x5a   : > { %7099 = vst [vmem:[#allocation19_spill] sm:$0xff] %v6198_v23  ;;  %v1502_v62 = vor.u32 %v1500_v29, %v1498_v44  ;;  %v1509_v56 = vor.u32 %v1507_v40, %v1505_v53  ;;  %v1524_v58 = vshll.u32 %v6091_v10, 16  ;;  %v1531_v40 = vshll.u32 %v6141_v8, 16 }
  0x5b   : > { %v1495_v42 = vor.u32 %v1493_v21, %v1491_v19  ;;  %v6216_v21 = vcombine.low %v246_v33, %v247_v4  ;;  %v1514_v19 = vshrl.u32 %v6063_v32, 16  ;;  %v1519_v4 = vrot.slane %v1517_v47, 1 }
  0x5c   : > { %v6220_v61 = vsel %vm1412_vm2, %v1502_v62, %v1505_v53  ;;  %v6224_v41 = vsel %vm1412_vm2, %v1509_v56, %v1512_v15  ;;  %v1526_v29 = vrot.slane %v1524_v58, 1  ;;  %v1528_v53 = vshrl.u32 %v6091_v10, 16 }
  0x5d   : > { %v6204_v35 = vsel %vm1412_vm2, %v1495_v42, %v1498_v44  ;;  %7101 = vst [vmem:[#allocation21_spill] sm:$0xff] %v6220_v61  ;;  %7102 = vst [vmem:[#allocation22_spill] sm:$0xff] %v6224_v41  ;;  %v1521_v42 = vshrl.u32 %v6081_v63, 16  ;;  %v1516_v33 = vor.u32 %v1514_v19, %v1512_v15  ;;  %v1134_v62 = vsel %vm456_vm0, %v5885_v11, 0  ;;  %v6251_v15 = vld [vmem:[%s7040_s1 + $0x2] sm:$0x3] }
  0x5e   : > { %7100 = vst [vmem:[#allocation20_spill] sm:$0xff] %v6204_v35  ;;  %v1535_v47 = vshrl.u32 %v6141_v8, 16  ;;  %v1533_v19 = vrot.slane %v1531_v40, 1  ;;  %v1530_v11 = vor.u32 %v1528_v53, %v1526_v29  ;;  %v1552_v53 = vshll.u32 %v6178_v26, 16 }
  0x5f   : > { %4844 = vmatmul.mubr.msk.bf16.gmra.mrb[36].mxu1 %vm383_vm1, %v6172_v57  ;;  %v1523_v44 = vor.u32 %v1521_v42, %v1519_v4  ;;  %v6238_v49 = vsel %vm1412_vm2, %v1516_v33, %v1519_v4  ;;  %v1545_v4 = vshll.u32 %v6172_v57, 16 }
  0x60   : > { %5066 = vmatmul.mubr.msk.bf16.gmra.mrb[8].mxu0 %vm383_vm1, %v6176_v31  ;;  %4847 = vmatprep.mubr.msk.bf16.mxu1 %vm383_vm1, %v6178_v26  ;;  %7103 = vst [vmem:[#allocation23_spill] sm:$0xff] %v6238_v49  ;;  %v1537_v42 = vor.u32 %v1535_v47, %v1533_v19  ;;  %v6265_v33 = vsel %vm1412_vm2, %v1530_v11, %v1533_v19  ;;  %v1554_v19 = vrot.slane %v1552_v53, 1  ;;  %v1559_v11 = vshll.u32 %v6194_v52, 16 }
  0x61   : > { %5069 = vmatprep.mubr.msk.bf16.mxu0 %vm383_vm1, %v6182_v51  ;;  %v6244_v56 = vsel %vm1412_vm2, %v1523_v44, %v1526_v29  ;;  %7105 = vst [vmem:[#allocation25_spill] sm:$0xff] %v6265_v33  ;;  %v1542_v44 = vshrl.u32 %v6153_v2, 16  ;;  %v1549_v29 = vshrl.u32 %v6172_v57, 16 }
  0x62   : > { %7104 = vst [vmem:[#allocation24_spill] sm:$0xff] %v6244_v56 }
  0x67   : > { %4848 = vmatmul.mubr.msk.bf16.gmra.mrb[40].mxu1 %vm383_vm1, %v6194_v52 }
  0x68   : > { %5070 = vmatmul.mubr.msk.bf16.gmra.mrb[12].mxu0 %vm383_vm1, %v6198_v23  ;;  %4851 = vmatprep.mubr.msk.bf16.mxu1 %vm383_vm1, %v6200_v60 }
  0x69   : > { %5073 = vmatprep.mubr.msk.bf16.mxu0 %vm383_vm1, %v6204_v35 }
  0x6f   : > { %4852 = vmatmul.mubr.msk.bf16.gmra.mrb[44].mxu1 %vm383_vm1, %v6216_v21 }
  0x70   : > { %5074 = vmatmul.mubr.msk.bf16.gmra.mrb[16].mxu0 %vm383_vm1, %v6220_v61  ;;  %4857 = vmatprep.mubr.msk.bf16.mxu1 %vm383_vm1, %v5891_v13 }
  0x71   : > { %5077 = vmatprep.mubr.msk.bf16.mxu0 %vm383_vm1, %v6224_v41  ;;  %v1538_v41 = vshll.u32 %v6153_v2, 16 }
  0x73   : > { %v1540_v58 = vrot.slane %v1538_v41, 1  ;;  %v1547_v41 = vrot.slane %v1545_v4, 1  ;;  %v1563_v4 = vshrl.u32 %v6194_v52, 16 }
  0x75   : > { %v6269_v40 = vsel %vm1412_vm2, %v1537_v42, %v1540_v58  ;;  %v1551_v47 = vor.u32 %v1549_v29, %v1547_v41 }
  0x76   : > { %7106 = vst [vmem:[#allocation26_spill] sm:$0xff] %v6269_v40 }
  0x77   : > { %4858 = vmatmul.mubr.msk.bf16.vlgmr.msra.gmra.mrb[0].mxu1 %vm383_vm1, %v5896_v17 }
  0x78   : > { %5078 = vmatmul.mubr.msk.bf16.gmra.mrb[20].mxu0 %vm383_vm1, %v6238_v49  ;;  %4906 = vmatpush3.bf16.msra.mxu1 %v1134_v62  ;;  %v1544_v62 = vor.u32 %v1542_v44, %v1540_v58  ;;  %v6292_v49 = vld [vmem:[%s5873_s27 + $0xc4] sm:$0xf]  ;;  %v1561_v58 = vrot.slane %v1559_v11, 1  ;;  %v1570_v11 = vshrl.u32 %v6200_v60, 16 }
  0x79   : > { %5081 = vmatprep.mubr.msk.bf16.mxu0 %vm383_vm1, %v6244_v56  ;;  %4861 = vmatprep.mubr.msk.bf16.mxu1 %vm383_vm1, %v5907_v24  ;;  %v6287_v56 = vsel %vm1412_vm2, %v1551_v47, %v1554_v19 }
  0x7a   : > { %5692 = vmatprep.subr.msk.bf16.mxu1 %vm456_vm0, %v6251_v15  ;;  %v6283_v42 = vsel %vm1412_vm2, %v1544_v62, %v1547_v41  ;;  %7108 = vst [vmem:[#allocation28_spill] sm:$0xff] %v6287_v56  ;;  %v1565_v29 = vor.u32 %v1563_v4, %v1561_v58  ;;  %v6304_v41 = vcombine.low %v6146_v27, %v6292_v49  ;;  %v1573_v62 = vshll.u32 %v6216_v21, 16 }
  0x7b   : > { %7107 = vst [vmem:[#allocation27_spill] sm:$0xff] %v6283_v42 }
  0x7c   : > { %v1575_v4 = vrot.slane %v1573_v62, 1 }
  0x7f   : > { %4862 = vmatmul.mubr.msk.bf16.gmra.mrb[4].mxu1 %vm383_vm1, %v5909_v25 }
  0x80   : > { %5082 = vmatmul.mubr.msk.bf16.gmra.mrb[24].mxu0 %vm383_vm1, %v6265_v33  ;;  %4865 = vmatprep.mubr.msk.bf16.mxu1 %vm383_vm1, %v5917_v30  ;;  %v1556_v33 = vshrl.u32 %v6178_v26, 16 }
  0x81   : > { %5085 = vmatprep.mubr.msk.bf16.mxu0 %vm383_vm1, %v6269_v40  ;;  %v1566_v40 = vshll.u32 %v6200_v60, 16 }
  0x82   : > { %v1558_v44 = vor.u32 %v1556_v33, %v1554_v19  ;;  %v2461_v19 = vshll.u32 %v6304_v41, 16 }
  0x83   : > { %v1568_v53 = vrot.slane %v1566_v40, 1  ;;  %v1577_v40 = vshrl.u32 %v6216_v21, 16 }
  0x84   : > { %v6308_v47 = vsel %vm1412_vm2, %v1558_v44, %v1561_v58  ;;  %v2463_v61 = vrot.slane %v2461_v19, 1  ;;  %v6356_v19 = vld [vmem:[%s5873_s27 + $0xd8] ss:$0 sps:$4 sm:$0xff]  }
  0x85   : > { %7109 = vst [vmem:[#allocation29_spill] sm:$0xff] %v6308_v47  ;;  %v6318_v33 = vsel %vm1412_vm2, %v1565_v29, %v1568_v53  ;;  %v1572_v44 = vor.u32 %v1570_v11, %v1568_v53  ;;  %v6334_v29 = vor.u32 %v1577_v40, %v1575_v4  ;;  %7114 = vst [vmem:[#allocation34_spill] sm:$0xff] %v6356_v19 }
  0x86   : > { %7111 = vst [vmem:[#allocation31_spill] sm:$0xff] %v6318_v33 }
  0x87   : > { %4866 = vmatmul.mubr.msk.bf16.gmra.mrb[8].mxu1 %vm383_vm1, %v5932_v43  ;;  %7112 = vst [vmem:[#allocation32_spill] sm:$0xff] %v6334_v29  ;;  %v6341_v62 = vsel %vm1412_vm2, %v1572_v44, %v1575_v4 }
  0x88   : > { %5086 = vmatmul.mubr.msk.bf16.gmra.mrb[28].mxu0 %vm383_vm1, %v6283_v42  ;;  %4869 = vmatprep.mubr.msk.bf16.mxu1 %vm383_vm1, %v5951_v59  ;;  %v6312_v42 = vld [vmem:[%s5873_s27 + $0xc8] sm:$0xf]  ;;  %7113 = vst [vmem:[#allocation33_spill] sm:$0xff] %v6341_v62 }
  0x89   : > { %5089 = vmatprep.mubr.msk.bf16.mxu0 %vm383_vm1, %v6287_v56  ;;  %v6315_v56 = vld [vmem:[%s5873_s27 + $0xcc] sm:$0xf] }
  0x8a   : > { %7110 = vst [vmem:[#allocation30_spill] sm:$0xff] %v6315_v56  ;;  %v6328_v58 = vcombine.low %v6312_v42, %v6315_v56  ;;  %v2465_v56 = vshrl.u32 %v6304_v41, 16 }
  0x8c   : > { %v2468_v35 = vshll.u32 %v6328_v58, 16  ;;  %v2472_v23 = vshrl.u32 %v6328_v58, 16  ;;  %v2467_v40 = vor.u32 %v2465_v56, %v2463_v61  ;;  %v2779_v56 = vrot.slane %v5889_v12, 1 }
  0x8e   : > { %v2470_v11 = vrot.slane %v2468_v35, 1 }
  0x8f   : > { %4870 = vmatmul.mubr.msk.bf16.gmra.mrb[12].mxu1 %vm383_vm1, %v5961_v0 }
  0x90   : > { %5090 = vmatmul.mubr.msk.bf16.gmra.mrb[32].mxu0 %vm383_vm1, %v6308_v47  ;;  %4873 = vmatprep.mubr.msk.bf16.mxu1 %vm383_vm1, %v5982_v22  ;;  %v6337_v47 = vld [vmem:[%s5873_s27 + $0xd0] sm:$0xff]   ;;  %v2474_v4 = vor.u32 %v2472_v23, %v2470_v11 }
  0x91   : > { %5093 = vmatprep.mubr.msk.bf16.mxu0 %vm383_vm1, %v6318_v33  ;;  %v2464_v33 = vsel %vm1412_vm2, %v6334_v29, %v2463_v61  ;;  %v2475_v53 = vshll.u32 %v6337_v47, 16  ;;  %v2471_v29 = vsel %vm1412_vm2, %v2467_v40, %v2470_v11  ;;  %v2479_v51 = vshrl.u32 %v6337_v47, 16  ;;  %v6387_v11 = vld [vmem:[%s7040_s1 + $0x10] sm:$0x3] }
  0x92   : > { %v2778_v61 = vrot.slane %v5876_v6, 1  ;;  %v2783_v6 = vrot.slane %v5928_v38, 1  ;;  %v2785_v40 = vrot.slane %v5935_v46, 1 }
  0x93   : > { %v2477_v44 = vrot.slane %v2475_v53, 1 }
  0x94   : > { %v2780_v53 = vsel %vm2777_vm3, %v2778_v61, %v2779_v56 }
  0x95   : > { %v2478_v31 = vsel %vm1412_vm2, %v2474_v4, %v2477_v44  ;;  %v2481_v23 = vor.u32 %v2479_v51, %v2477_v44  ;;  %v2781_v51 = vrot.slane %v5898_v18, 1  ;;  %v6400_v4 = vsel %vm2777_vm3, %v2783_v6, %v2785_v40 }
  0x97   : > { %4874 = vmatmul.mubr.msk.bf16.gmra.mrb[16].mxu1 %vm383_vm1, %v5987_v28 }
  0x98   : > { %5094 = vmatmul.mubr.msk.bf16.gmra.mrb[36].mxu0 %vm383_vm1, %v6341_v62  ;;  %4877 = vmatprep.mubr.msk.bf16.mxu1 %vm383_vm1, %v6007_v45  ;;  %v2483_v62 = vshll.u32 %v6356_v19, 16  ;;  %v2797_v19 = vrot.slane %v6018_v54, 1 }
  0x99   : > { %5097 = vmatprep.mubr.msk.bf16.mxu0 %vm383_vm1, %v2464_v33 }
  0x9a   : > { %v2485_v35 = vrot.slane %v2483_v62, 1  ;;  %v2784_v62 = vsel %vm2777_vm3, %v2781_v51, %v2783_v6  ;;  %v2793_v6 = vrot.slane %v5994_v34, 1 }
  0x9c   : > { %v2486_v33 = vsel %vm1412_vm2, %v2481_v23, %v2485_v35  ;;  %v2789_v23 = vrot.slane %v5969_v7, 1  ;;  %v7115_v35 = vld [vmem:[#allocation4_spill] sm:$0xff] }
  0x9d   : > { %v2791_v61 = vrot.slane %v7115_v35, 1 }
  0x9f   : > { %4878 = vmatmul.mubr.msk.bf16.gmra.mrb[20].mxu1 %vm383_vm1, %v6012_v50 }
  0xa0   : > { %5098 = vmatmul.mubr.msk.bf16.gmra.mrb[40].mxu0 %vm383_vm1, %v2471_v29  ;;  %4881 = vmatprep.mubr.msk.bf16.mxu1 %vm383_vm1, %v6032_v5  ;;  %v3299_v29 = vsel %vm456_vm0, %v6108_v36, 0  ;;  %v2787_v36 = vrot.slane %v5965_v1, 1 }
  0xa1   : > { %5101 = vmatprep.mubr.msk.bf16.mxu0 %vm383_vm1, %v2478_v31  ;;  %v2782_v31 = vsel %vm2777_vm3, %v2779_v56, %v2781_v51  ;;  %v7118_v51 = vld [vmem:[#allocation12_spill] sm:$0xff] }
  0xa2   : > { %v6403_v44 = vsel %vm2777_vm3, %v2785_v40, %v2787_v36  ;;  %v6416_v56 = vsel %vm2777_vm3, %v2787_v36, %v2789_v23  ;;  %v7121_v36 = vld [vmem:[#allocation13_spill] sm:$0xff] }
  0xa7   : > { %4882 = vmatmul.mubr.msk.bf16.gmra.mrb[24].mxu1 %vm383_vm1, %v6084_v3 }
  0xa8   : > { %5102 = vmatmul.mubr.msk.bf16.gmra.mrb[44].mxu0 %vm383_vm1, %v2486_v33  ;;  %4885 = vmatprep.mubr.msk.bf16.mxu1 %vm383_vm1, %v6101_v20  ;;  %v6419_v33 = vsel %vm2777_vm3, %v2789_v23, %v2791_v61  ;;  %v7122_v23 = vld [vmem:[#allocation15_spill] sm:$0xff] }
  0xa9   : > { %5107 = vmatprep.mubr.msk.bf16.mxu0 %vm383_vm1, %v2780_v53  ;;  %7116 = vst [vmem:[#allocation4_spill] sm:$0xff] %v6419_v33  ;;  %v7117_v53 = vld [vmem:[#allocation11_spill] sm:$0xff] }
  0xaf   : > { %4886 = vmatmul.mubr.msk.bf16.gmra.mrb[28].mxu1 %vm383_vm1, %v6110_v37 }
  0xb0   : > { %5108 = vmatmul.mubr.msk.bf16.vlgmr.msra.gmra.mrb[0].mxu0 %vm383_vm1, %v2782_v31  ;;  %4889 = vmatprep.mubr.msk.bf16.mxu1 %vm383_vm1, %v6118_v48  ;;  %v7119_v31 = vld [vmem:[#allocation5_spill] sm:$0xff] }
  0xb1   : > { %5156 = vmatpush3.bf16.msra.mxu0 %v3299_v29  ;;  %5111 = vmatprep.mubr.msk.bf16.mxu0 %vm383_vm1, %v2784_v62  ;;  %v2795_v29 = vrot.slane %v7119_v31, 1  ;;  %v6432_v62 = vsel %vm2777_vm3, %v2791_v61, %v2793_v6  ;;  %v2799_v61 = vrot.slane %v6035_v14, 1 }
  0xb2   : > { %5698 = vmatprep.subr.msk.bf16.mxu0 %vm456_vm0, %v6387_v11  ;;  %7120 = vst [vmem:[#allocation11_spill] sm:$0xff] %v6432_v62 }
  0xb3   : > { %v6435_v40 = vsel %vm2777_vm3, %v2793_v6, %v2795_v29  ;;  %v6449_v6 = vcombine.low %v6292_v49, %v6312_v42  ;;  %v2801_v49 = vrot.slane %v6038_v16, 1  ;;  %v2803_v42 = vrot.slane %v6057_v39, 1 }
  0xb7   : > { %4890 = vmatmul.mubr.msk.bf16.gmra.mrb[32].mxu1 %vm383_vm1, %v6125_v55 }
  0xb8   : > { %5112 = vmatmul.mubr.msk.bf16.gmra.mrb[4].mxu0 %vm383_vm1, %v6400_v4  ;;  %4893 = vmatprep.mubr.msk.bf16.mxu1 %vm383_vm1, %v6133_v9 }
  0xb9   : > { %5115 = vmatprep.mubr.msk.bf16.mxu0 %vm383_vm1, %v6403_v44 }
  0xbf   : > { %4894 = vmatmul.mubr.msk.bf16.gmra.mrb[36].mxu1 %vm383_vm1, %v7117_v53 }
  0xc0   : > { %5116 = vmatmul.mubr.msk.bf16.gmra.mrb[8].mxu0 %vm383_vm1, %v6416_v56  ;;  %4897 = vmatprep.mubr.msk.bf16.mxu1 %vm383_vm1, %v7118_v51 }
  0xc1   : > { %5119 = vmatprep.mubr.msk.bf16.mxu0 %vm383_vm1, %v6419_v33  ;;  %v6452_v33 = vsel %vm2777_vm3, %v2795_v29, %v2797_v19  ;;  %v6468_v29 = vsel %vm2777_vm3, %v2799_v61, %v2801_v49 }
  0xc2   : > { %7123 = vst [vmem:[#allocation12_spill] sm:$0xff] %v6452_v33  ;;  %7124 = vst [vmem:[#allocation5_spill] sm:$0xff] %v6468_v29 }
  0xc7   : > { %4898 = vmatmul.mubr.msk.bf16.gmra.mrb[40].mxu1 %vm383_vm1, %v7121_v36 }
  0xc8   : > { %5120 = vmatmul.mubr.msk.bf16.gmra.mrb[12].mxu0 %vm383_vm1, %v6432_v62  ;;  %4901 = vmatprep.mubr.msk.bf16.mxu1 %vm383_vm1, %v7122_v23  ;;  %v6455_v62 = vsel %vm2777_vm3, %v2797_v19, %v2799_v61  ;;  %v1658_v19 = vsel %vm456_vm0, %v6251_v15, 0  ;;  %v2807_v15 = vrot.slane %v6081_v63, 1  ;;  %v7125_v61 = vld [vmem:[#allocation2_spill] sm:$0xff] }
  0xc9   : > { %5123 = vmatprep.mubr.msk.bf16.mxu0 %vm383_vm1, %v6435_v40 }
  0xcf   : > { %4902 = vmatmul.mubr.msk.bf16.gmra.mrb[44].mxu1 %vm383_vm1, %v6449_v6 }
  0xd0   : > { %5124 = vmatmul.mubr.msk.bf16.gmra.mrb[16].mxu0 %vm383_vm1, %v6452_v33  ;;  %4907 = vmatprep.mubr.msk.bf16.mxu1 %vm383_vm1, %v5928_v38  ;;  %v6473_v33 = vsel %vm2777_vm3, %v2801_v49, %v2803_v42  ;;  %v2805_v38 = vrot.slane %v6063_v32, 1 }
  0xd1   : > { %5127 = vmatprep.mubr.msk.bf16.mxu0 %vm383_vm1, %v6455_v62 }
  0xd2   : > { %v6488_v49 = vsel %vm2777_vm3, %v2803_v42, %v2805_v38 }
  0xd7   : > { %4908 = vmatmul.mubr.msk.bf16.vlgmr.msra.gmra.mrb[0].mxu1 %vm383_vm1, %v5935_v46  ;;  %v2809_v46 = vrot.slane %v6091_v10, 1 }
  0xd8   : > { %5128 = vmatmul.mubr.msk.bf16.gmra.mrb[20].mxu0 %vm383_vm1, %v6468_v29  ;;  %4956 = vmatpush3.bf16.msra.mxu1 %v1658_v19  ;;  %v6491_v29 = vsel %vm2777_vm3, %v2805_v38, %v2807_v15 }
  0xd9   : > { %5131 = vmatprep.mubr.msk.bf16.mxu0 %vm383_vm1, %v6473_v33  ;;  %4911 = vmatprep.mubr.msk.bf16.mxu1 %vm383_vm1, %v5965_v1  ;;  %v2811_v1 = vrot.slane %v6141_v8, 1  ;;  %v6504_v42 = vsel %vm2777_vm3, %v2807_v15, %v2809_v46 }
  0xda   : > { %5694 = vmatprep.subr.msk.bf16.mxu1 %vm456_vm0, %v7125_v61 }
  0xdb   : > { %v6507_v19 = vsel %vm2777_vm3, %v2809_v46, %v2811_v1 }
  0xdf   : > { %4912 = vmatmul.mubr.msk.bf16.gmra.mrb[4].mxu1 %vm383_vm1, %v5969_v7  ;;  %v2813_v7 = vrot.slane %v6153_v2, 1 }
  0xe0   : > { %5132 = vmatmul.mubr.msk.bf16.gmra.mrb[24].mxu0 %vm383_vm1, %v6488_v49  ;;  %4915 = vmatprep.mubr.msk.bf16.mxu1 %vm383_vm1, %v7115_v35  ;;  %v2815_v35 = vrot.slane %v6172_v57, 1 }
  0xe1   : > { %5135 = vmatprep.mubr.msk.bf16.mxu0 %vm383_vm1, %v6491_v29  ;;  %v6520_v38 = vsel %vm2777_vm3, %v2811_v1, %v2813_v7 }
  0xe2   : > { %v6523_v15 = vsel %vm2777_vm3, %v2813_v7, %v2815_v35  ;;  %v6558_v7 = vcombine.low %v6146_v27, %v6146_v27  ;;  %v3177_v27 = vrot.slane %v5891_v13, 1  ;;  %v3182_v13 = vrot.slane %v5909_v25, 1 }
  0xe7   : > { %4916 = vmatmul.mubr.msk.bf16.gmra.mrb[8].mxu1 %vm383_vm1, %v5994_v34  ;;  %v2817_v34 = vrot.slane %v6178_v26, 1 }
  0xe8   : > { %5136 = vmatmul.mubr.msk.bf16.gmra.mrb[28].mxu0 %vm383_vm1, %v6504_v42  ;;  %4919 = vmatprep.mubr.msk.bf16.mxu1 %vm383_vm1, %v7119_v31  ;;  %v2819_v31 = vrot.slane %v6194_v52, 1 }
  0xe9   : > { %5139 = vmatprep.mubr.msk.bf16.mxu0 %vm383_vm1, %v6507_v19  ;;  %v6536_v61 = vsel %vm2777_vm3, %v2815_v35, %v2817_v34  ;;  %v3178_v35 = vrot.slane %v5896_v17, 1 }
  0xea   : > { %v6539_v46 = vsel %vm2777_vm3, %v2817_v34, %v2819_v31 }
  0xef   : > { %4920 = vmatmul.mubr.msk.bf16.gmra.mrb[12].mxu1 %vm383_vm1, %v6018_v54  ;;  %v2821_v54 = vrot.slane %v6200_v60, 1 }
  0xf0   : > { %5140 = vmatmul.mubr.msk.bf16.gmra.mrb[32].mxu0 %vm383_vm1, %v6520_v38  ;;  %4923 = vmatprep.mubr.msk.bf16.mxu1 %vm383_vm1, %v6035_v14  ;;  %v6551_v14 = vrot.slane %v6216_v21, 1 }
  0xf1   : > { %5143 = vmatprep.mubr.msk.bf16.mxu0 %vm383_vm1, %v6523_v15  ;;  %v6554_v1 = vsel %vm2777_vm3, %v2819_v31, %v2821_v54  ;;  %v3179_v31 = vsel %vm2777_vm3, %v3177_v27, %v3178_v35 }
  0xf7   : > { %4924 = vmatmul.mubr.msk.bf16.gmra.mrb[16].mxu1 %vm383_vm1, %v6038_v16  ;;  %v6562_v16 = vsel %vm2777_vm3, %v2821_v54, %v6551_v14 }
  0xf8   : > { %5144 = vmatmul.mubr.msk.bf16.gmra.mrb[36].mxu0 %vm383_vm1, %v6536_v61  ;;  %4927 = vmatprep.mubr.msk.bf16.mxu1 %vm383_vm1, %v6057_v39  ;;  %v2825_v39 = vrot.slane %v6558_v7, 1 }
  0xf9   : > { %5147 = vmatprep.mubr.msk.bf16.mxu0 %vm383_vm1, %v6539_v46 }
  0xfa   : > { %v2826_v34 = vsel %vm2777_vm3, %v6551_v14, %v2825_v39 }
  0xff   : > { %4928 = vmatmul.mubr.msk.bf16.gmra.mrb[20].mxu1 %vm383_vm1, %v6063_v32  ;;  %v3180_v32 = vrot.slane %v5907_v24, 1  ;;  %v3186_v24 = vrot.slane %v5932_v43, 1 }
 0x100   : > { %5148 = vmatmul.mubr.msk.bf16.gmra.mrb[40].mxu0 %vm383_vm1, %v6554_v1  ;;  %4931 = vmatprep.mubr.msk.bf16.mxu1 %vm383_vm1, %v6081_v63  ;;  %v3597_v63 = vsel %vm456_vm0, %v6387_v11, 0 }
 0x101   : > { %5151 = vmatprep.mubr.msk.bf16.mxu0 %vm383_vm1, %v6562_v16  ;;  %v3181_v17 = vsel %vm2777_vm3, %v3178_v35, %v3180_v32  ;;  %v3183_v54 = vsel %vm2777_vm3, %v3180_v32, %v3182_v13  ;;  %v1423_v32 = vshrl.u32 %v5889_v12, 16 }
 0x107   : > { %4932 = vmatmul.mubr.msk.bf16.gmra.mrb[24].mxu1 %vm383_vm1, %v6091_v10 }
 0x108   : > { %5152 = vmatmul.mubr.msk.bf16.gmra.mrb[44].mxu0 %vm383_vm1, %v2826_v34  ;;  %4935 = vmatprep.mubr.msk.bf16.mxu1 %vm383_vm1, %v6141_v8  ;;  %v3184_v8 = vrot.slane %v5917_v30, 1  ;;  %v3190_v30 = vrot.slane %v5961_v0, 1  ;;  %v1419_v34 = vshll.u32 %v5889_v12, 16  ;;  %v3200_v12 = vrot.slane %v6032_v5, 1 }
 0x109   : > { %5157 = vmatprep.mubr.msk.bf16.mxu0 %vm383_vm1, %v3179_v31 }
 0x10a   : > { %v3185_v25 = vsel %vm2777_vm3, %v3182_v13, %v3184_v8  ;;  %v3187_v10 = vsel %vm2777_vm3, %v3184_v8, %v3186_v24  ;;  %v1426_v13 = vshll.u32 %v5898_v18, 16  ;;  %v3202_v8 = vrot.slane %v6084_v3, 1 }
 0x10f   : > { %4936 = vmatmul.mubr.msk.bf16.gmra.mrb[28].mxu1 %vm383_vm1, %v6153_v2  ;;  %v3188_v2 = vrot.slane %v5951_v59, 1  ;;  %v3194_v59 = vrot.slane %v5987_v28, 1  ;;  %v3198_v28 = vrot.slane %v6012_v50, 1  ;;  %v1428_v50 = vrot.slane %v1426_v13, 1  ;;  %v7132_v13 = vld [vmem:[#allocation16_spill] sm:$0xff] }
 0x110   : > { %5158 = vmatmul.mubr.msk.bf16.vlgmr.msra.gmra.mrb[0].mxu0 %vm383_vm1, %v3181_v17  ;;  %4939 = vmatprep.mubr.msk.bf16.mxu1 %vm383_vm1, %v6172_v57 }
 0x111   : > { %5206 = vmatpush3.bf16.msra.mxu0 %v3597_v63  ;;  %5161 = vmatprep.mubr.msk.bf16.mxu0 %vm383_vm1, %v3183_v54  ;;  %v3189_v43 = vsel %vm2777_vm3, %v3186_v24, %v3188_v2  ;;  %v3191_v57 = vsel %vm2777_vm3, %v3188_v2, %v3190_v30  ;;  %v1430_v54 = vshrl.u32 %v5898_v18, 16  ;;  %v7126_v2 = vld [vmem:[#allocation6_spill] sm:$0xff] }
 0x113   : > { %v1432_v24 = vor.u32 %v1430_v54, %v1428_v50  ;;  %v3218_v54 = vrot.slane %v7121_v36, 1 }
 0x117   : > { %4940 = vmatmul.mubr.msk.bf16.gmra.mrb[32].mxu1 %vm383_vm1, %v6178_v26  ;;  %v3192_v26 = vrot.slane %v5982_v22, 1  ;;  %v3196_v22 = vrot.slane %v6007_v45, 1 }
 0x118   : > { %5162 = vmatmul.mubr.msk.bf16.gmra.mrb[4].mxu0 %vm383_vm1, %v3185_v25  ;;  %4943 = vmatprep.mubr.msk.bf16.mxu1 %vm383_vm1, %v6194_v52  ;;  %v5779_v52 = vld [vmem:[%s5873_s27] sm:$0xff]   ;;  %v3201_v25 = vsel %vm2777_vm3, %v3198_v28, %v3200_v12 }
 0x119   : > { %5165 = vmatprep.mubr.msk.bf16.mxu0 %vm383_vm1, %v3187_v10  ;;  %v1415_v0 = vshll.u32 %v5779_v52, 16  ;;  %v3193_v11 = vsel %vm2777_vm3, %v3190_v30, %v3192_v26  ;;  %v3195_v39 = vsel %vm2777_vm3, %v3192_v26, %v3194_v59  ;;  %v1413_v27 = vshrl.u32 %v5779_v52, 16 }
 0x11a   : > { %v3197_v31 = vsel %vm2777_vm3, %v3194_v59, %v3196_v22  ;;  %v3199_v17 = vsel %vm2777_vm3, %v3196_v22, %v3198_v28  ;;  %v3203_v10 = vsel %vm2777_vm3, %v3200_v12, %v3202_v8  ;;  %v1436_v30 = vsel %vm1412_vm2, %v1432_v24, %v7126_v2  ;;  %v7130_v22 = vld [vmem:[#allocation10_spill] sm:$0xff] }
 0x11b   : > { %v1417_v35 = vrot.slane %v1415_v0, 1  ;;  %v3206_v26 = vrot.slane %v6110_v37, 1  ;;  %v7128_v0 = vld [vmem:[#allocation8_spill] sm:$0xff]  ;;  %v7131_v28 = vld [vmem:[#allocation14_spill] sm:$0xff]  ;;  %v3220_v24 = vrot.slane %v7122_v23, 1 }
 0x11f   : > { %4944 = vmatmul.mubr.msk.bf16.gmra.mrb[36].mxu1 %vm383_vm1, %v6200_v60  ;;  %v1418_v60 = vor.u32 %v1417_v35, %v1413_v27  ;;  %v3210_v27 = vrot.slane %v6125_v55, 1 }
 0x120   : > { %5166 = vmatmul.mubr.msk.bf16.gmra.mrb[8].mxu0 %vm383_vm1, %v3189_v43  ;;  %4947 = vmatprep.mubr.msk.bf16.mxu1 %vm383_vm1, %v6216_v21  ;;  %v1421_v21 = vrot.slane %v1419_v34, 1  ;;  %v7127_v43 = vld [vmem:[#allocation3_spill] sm:$0xff] }
 0x121   : > { %5169 = vmatprep.mubr.msk.bf16.mxu0 %vm383_vm1, %v3191_v57  ;;  %v3204_v57 = vrot.slane %v6101_v20, 1 }
 0x122   : > { %v1422_v63 = vsel %vm1412_vm2, %v1418_v60, %v1421_v21  ;;  %v1425_v45 = vor.u32 %v1423_v32, %v1421_v21  ;;  %v3212_v60 = vrot.slane %v6133_v9, 1  ;;  %v3214_v21 = vrot.slane %v7117_v53, 1 }
 0x123   : > { %v3205_v59 = vsel %vm2777_vm3, %v3202_v8, %v3204_v57  ;;  %v3207_v52 = vsel %vm2777_vm3, %v3204_v57, %v3206_v26  ;;  %v7135_v8 = vld [vmem:[#allocation19_spill] sm:$0xff]  ;;  %v7138_v57 = vld [vmem:[#allocation21_spill] sm:$0xff] }
 0x124   : > { %v1429_v18 = vsel %vm1412_vm2, %v1425_v45, %v1428_v50  ;;  %v3215_v32 = vsel %vm2777_vm3, %v3212_v60, %v3214_v21  ;;  %v7134_v50 = vld [vmem:[#allocation18_spill] sm:$0xff] }
 0x127   : > { %4948 = vmatmul.mubr.msk.bf16.gmra.mrb[40].mxu1 %vm383_vm1, %v6304_v41 }
 0x128   : > { %5170 = vmatmul.mubr.msk.bf16.gmra.mrb[12].mxu0 %vm383_vm1, %v3193_v11  ;;  %4951 = vmatprep.mubr.msk.bf16.mxu1 %vm383_vm1, %v6328_v58  ;;  %v7129_v11 = vld [vmem:[#allocation9_spill] sm:$0xff] }
 0x129   : > { %5173 = vmatprep.mubr.msk.bf16.mxu0 %vm383_vm1, %v3195_v39  ;;  %v3208_v39 = vrot.slane %v6118_v48, 1 }
 0x12b   : > { %v3209_v35 = vsel %vm2777_vm3, %v3206_v26, %v3208_v39  ;;  %v3211_v34 = vsel %vm2777_vm3, %v3208_v39, %v3210_v27  ;;  %v7142_v39 = vld [vmem:[#allocation25_spill] sm:$0xff] }
 0x12f   : > { %4952 = vmatmul.mubr.msk.bf16.gmra.mrb[44].mxu1 %vm383_vm1, %v6337_v47 }
 0x130   : > { %5174 = vmatmul.mubr.msk.bf16.gmra.mrb[16].mxu0 %vm383_vm1, %v3197_v31  ;;  %4957 = vmatprep.mubr.msk.bf16.mxu1 %vm383_vm1, %v1422_v63  ;;  %v3213_v31 = vsel %vm2777_vm3, %v3210_v27, %v3212_v60  ;;  %v3216_v63 = vrot.slane %v7118_v51, 1  ;;  %v7143_v27 = vld [vmem:[#allocation4_spill] sm:$0xff]  ;;  %v2023_v60 = vshrl.u32 %v6032_v5, 16  ;;  %v2033_v5 = vshll.u32 %v6101_v20, 16 }
 0x131   : > { %5177 = vmatprep.mubr.msk.bf16.mxu0 %vm383_vm1, %v3199_v17  ;;  %v7133_v17 = vld [vmem:[#allocation17_spill] sm:$0xff] }
 0x132   : > { %v3217_v45 = vsel %vm2777_vm3, %v3214_v21, %v3216_v63  ;;  %v3219_v12 = vsel %vm2777_vm3, %v3216_v63, %v3218_v54  ;;  %v2026_v21 = vshll.u32 %v6084_v3, 16 }
 0x137   : > { %4958 = vmatmul.mubr.msk.bf16.vlgmr.msra.gmra.mrb[0].mxu1 %vm383_vm1, %v1429_v18  ;;  %v3221_v18 = vsel %vm2777_vm3, %v3218_v54, %v3220_v24  ;;  %v7154_v54 = vld [vmem:[#allocation32_spill] sm:$0xff] }
 0x138   : > { %5178 = vmatmul.mubr.msk.bf16.gmra.mrb[20].mxu0 %vm383_vm1, %v3201_v25  ;;  %5256 = vmatpush3.bf16.msra.mxu1 %v7127_v43  ;;  %v3222_v25 = vrot.slane %v6449_v6, 1  ;;  %v7137_v43 = vld [vmem:[#allocation20_spill] sm:$0xff] }
 0x139   : > { %5181 = vmatprep.mubr.msk.bf16.mxu0 %vm383_vm1, %v3203_v10  ;;  %4961 = vmatprep.mubr.msk.bf16.mxu1 %vm383_vm1, %v1436_v30  ;;  %v7136_v10 = vld [vmem:[#allocation30_spill] sm:$0xff] }
 0x13a   : > { %v6698_v2 = vcombine.low %v7136_v10, %v7136_v10  ;;  %v3223_v30 = vsel %vm2777_vm3, %v3220_v24, %v3222_v25  ;;  %v2035_v24 = vrot.slane %v2033_v5, 1  ;;  %v2047_v10 = vshll.u32 %v6118_v48, 16 }
 0x13c   : > { %v3224_v26 = vrot.slane %v6698_v2, 1 }
 0x13f   : > { %4962 = vmatmul.mubr.msk.bf16.gmra.mrb[4].mxu1 %vm383_vm1, %v7128_v0  ;;  %v7140_v0 = vld [vmem:[#allocation23_spill] sm:$0xff] }
 0x140   : > { %5182 = vmatmul.mubr.msk.bf16.gmra.mrb[24].mxu0 %vm383_vm1, %v3205_v59  ;;  %4965 = vmatprep.mubr.msk.bf16.mxu1 %vm383_vm1, %v7129_v11  ;;  %v3225_v59 = vsel %vm2777_vm3, %v3222_v25, %v3224_v26  ;;  %v7141_v11 = vld [vmem:[#allocation24_spill] sm:$0xff] }
 0x141   : > { %5185 = vmatprep.mubr.msk.bf16.mxu0 %vm383_vm1, %v3207_v52  ;;  %v7139_v52 = vld [vmem:[#allocation22_spill] sm:$0xff] }
 0x147   : > { %4966 = vmatmul.mubr.msk.bf16.gmra.mrb[8].mxu1 %vm383_vm1, %v7130_v22  ;;  %v7149_v22 = vld [vmem:[#allocation29_spill] sm:$0xff] }
 0x148   : > { %5186 = vmatmul.mubr.msk.bf16.gmra.mrb[28].mxu0 %vm383_vm1, %v3209_v35  ;;  %4969 = vmatprep.mubr.msk.bf16.mxu1 %vm383_vm1, %v7131_v28  ;;  %v7144_v35 = vld [vmem:[#allocation26_spill] sm:$0xff]  ;;  %v1581_v28 = vshll.u32 %v6558_v7, 16  ;;  %v2028_v7 = vrot.slane %v2026_v21, 1  ;;  %v2086_v21 = vshrl.u32 %v7121_v36, 16 }
 0x149   : > { %5189 = vmatprep.mubr.msk.bf16.mxu0 %vm383_vm1, %v3211_v34  ;;  %v7146_v34 = vld [vmem:[#allocation27_spill] sm:$0xff] }
 0x14f   : > { %4970 = vmatmul.mubr.msk.bf16.gmra.mrb[12].mxu1 %vm383_vm1, %v7132_v13  ;;  %v1583_v13 = vrot.slane %v1581_v28, 1 }
 0x150   : > { %5190 = vmatmul.mubr.msk.bf16.gmra.mrb[32].mxu0 %vm383_vm1, %v3213_v31  ;;  %4973 = vmatprep.mubr.msk.bf16.mxu1 %vm383_vm1, %v7133_v17  ;;  %v7150_v31 = vld [vmem:[#allocation31_spill] sm:$0xff] }
 0x151   : > { %5193 = vmatprep.mubr.msk.bf16.mxu0 %vm383_vm1, %v3215_v32  ;;  %v7152_v32 = vld [vmem:[#allocation33_spill] sm:$0xff]  ;;  %v7153_v17 = vld [vmem:[#allocation7_spill] sm:$0xff] }
 0x152   : > { %v2025_v63 = vor.u32 %v2023_v60, %v7153_v17  ;;  %v2089_v60 = vshll.u32 %v7122_v23, 16 }
 0x157   : > { %4974 = vmatmul.mubr.msk.bf16.gmra.mrb[16].mxu1 %vm383_vm1, %v7134_v50  ;;  %v2037_v50 = vshrl.u32 %v6101_v20, 16 }
 0x158   : > { %5194 = vmatmul.mubr.msk.bf16.gmra.mrb[36].mxu0 %vm383_vm1, %v3217_v45  ;;  %4977 = vmatprep.mubr.msk.bf16.mxu1 %vm383_vm1, %v7135_v8  ;;  %v1584_v45 = vsel %vm1412_vm2, %v7154_v54, %v1583_v13  ;;  %v2040_v8 = vshll.u32 %v6110_v37, 16 }
 0x159   : > { %5197 = vmatprep.mubr.msk.bf16.mxu0 %vm383_vm1, %v3219_v12  ;;  %v2029_v12 = vsel %vm1412_vm2, %v2025_v63, %v2028_v7  ;;  %v2100_v63 = vshrl.u32 %v6449_v6, 16 }
 0x15f   : > { %4978 = vmatmul.mubr.msk.bf16.gmra.mrb[20].mxu1 %vm383_vm1, %v7137_v43 }
 0x160   : > { %5198 = vmatmul.mubr.msk.bf16.gmra.mrb[40].mxu0 %vm383_vm1, %v3221_v18  ;;  %4981 = vmatprep.mubr.msk.bf16.mxu1 %vm383_vm1, %v7138_v57  ;;  %v2039_v18 = vor.u32 %v2037_v50, %v2035_v24  ;;  %v2054_v57 = vshll.u32 %v6125_v55, 16 }
 0x161   : > { %5201 = vmatprep.mubr.msk.bf16.mxu0 %vm383_vm1, %v3223_v30  ;;  %v2044_v30 = vshrl.u32 %v6110_v37, 16 }
 0x162   : > { %v2056_v37 = vrot.slane %v2054_v57, 1 }
 0x167   : > { %4982 = vmatmul.mubr.msk.bf16.gmra.mrb[24].mxu1 %vm383_vm1, %v7139_v52  ;;  %v2061_v52 = vshll.u32 %v6133_v9, 16 }
 0x168   : > { %5202 = vmatmul.mubr.msk.bf16.gmra.mrb[44].mxu0 %vm383_vm1, %v3225_v59  ;;  %4985 = vmatprep.mubr.msk.bf16.mxu1 %vm383_vm1, %v7140_v0  ;;  %v2058_v0 = vshrl.u32 %v6125_v55, 16 }
 0x169   : > { %5207 = vmatprep.mubr.msk.bf16.mxu0 %vm383_vm1, %v6400_v4  ;;  %v7145_v4 = vld [vmem:[#allocation11_spill] sm:$0xff] }
 0x16f   : > { %4986 = vmatmul.mubr.msk.bf16.gmra.mrb[28].mxu1 %vm383_vm1, %v7141_v11 }
 0x170   : > { %5208 = vmatmul.mubr.msk.bf16.vlgmr.msra.gmra.mrb[0].mxu0 %vm383_vm1, %v6403_v44  ;;  %4989 = vmatprep.mubr.msk.bf16.mxu1 %vm383_vm1, %v7142_v39  ;;  %v7147_v44 = vld [vmem:[#allocation28_spill] sm:$0xff]  ;;  %v2068_v39 = vshll.u32 %v7117_v53, 16 }
 0x171   : > { %5211 = vmatprep.mubr.msk.bf16.mxu0 %vm383_vm1, %v6416_v56  ;;  %v7148_v56 = vld [vmem:[#allocation12_spill] sm:$0xff] }
 0x172   : > { %v2070_v55 = vrot.slane %v2068_v39, 1 }
 0x177   : > { %4990 = vmatmul.mubr.msk.bf16.gmra.mrb[32].mxu1 %vm383_vm1, %v7144_v35 }
 0x178   : > { %5212 = vmatmul.mubr.msk.bf16.gmra.mrb[4].mxu0 %vm383_vm1, %v7143_v27  ;;  %4993 = vmatprep.mubr.msk.bf16.mxu1 %vm383_vm1, %v7146_v34  ;;  %v2060_v27 = vor.u32 %v2058_v0, %v2056_v37  ;;  %v2072_v34 = vshrl.u32 %v7117_v53, 16 }
 0x179   : > { %5215 = vmatprep.mubr.msk.bf16.mxu0 %vm383_vm1, %v7145_v4  ;;  %v2075_v4 = vshll.u32 %v7118_v51, 16 }
 0x17f   : > { %4994 = vmatmul.mubr.msk.bf16.gmra.mrb[36].mxu1 %vm383_vm1, %v7147_v44 }
 0x180   : > { %5216 = vmatmul.mubr.msk.bf16.gmra.mrb[8].mxu0 %vm383_vm1, %v6435_v40  ;;  %4997 = vmatprep.mubr.msk.bf16.mxu1 %vm383_vm1, %v7149_v22  ;;  %v7151_v40 = vld [vmem:[#allocation5_spill] sm:$0xff]  ;;  %v2074_v22 = vor.u32 %v2072_v34, %v2070_v55 }
 0x181   : > { %5219 = vmatprep.mubr.msk.bf16.mxu0 %vm383_vm1, %v7148_v56  ;;  %v2082_v56 = vshll.u32 %v7121_v36, 16  ;;  %v3576_v36 = vrot.slane %v6304_v41, 1  ;;  %v3578_v41 = vrot.slane %v6328_v58, 1 }
 0x183   : > { %v2084_v53 = vrot.slane %v2082_v56, 1  ;;  %v3579_v54 = vsel %vm2777_vm3, %v3576_v36, %v3578_v41 }
 0x187   : > { %4998 = vmatmul.mubr.msk.bf16.gmra.mrb[40].mxu1 %vm383_vm1, %v7150_v31 }
 0x188   : > { %5220 = vmatmul.mubr.msk.bf16.gmra.mrb[12].mxu0 %vm383_vm1, %v6455_v62  ;;  %5001 = vmatprep.mubr.msk.bf16.mxu1 %vm383_vm1, %v7152_v32  ;;  %v2030_v62 = vshrl.u32 %v6084_v3, 16  ;;  %v2042_v3 = vrot.slane %v2040_v8, 1  ;;  %v2088_v32 = vor.u32 %v2086_v21, %v2084_v53 }
 0x189   : > { %5223 = vmatprep.mubr.msk.bf16.mxu0 %vm383_vm1, %v7151_v40  ;;  %v2096_v40 = vshll.u32 %v6449_v6, 16 }
 0x18a   : > { %v2032_v25 = vor.u32 %v2030_v62, %v2028_v7  ;;  %v2043_v43 = vsel %vm1412_vm2, %v2039_v18, %v2042_v3  ;;  %v2046_v26 = vor.u32 %v2044_v30, %v2042_v3  ;;  %v2104_v7 = vshll.u32 %v6698_v2, 16 }
 0x18b   : > { %v2098_v17 = vrot.slane %v2096_v40, 1  ;;  %v3580_v2 = vrot.slane %v6337_v47, 1 }
 0x18c   : > { %v2036_v20 = vsel %vm1412_vm2, %v2032_v25, %v2035_v24  ;;  %v2106_v6 = vrot.slane %v2104_v7, 1 }
 0x18f   : > { %5002 = vmatmul.mubr.msk.bf16.gmra.mrb[44].mxu1 %vm383_vm1, %v1584_v45  ;;  %v3581_v45 = vsel %vm2777_vm3, %v3578_v41, %v3580_v2 }
 0x190   : > { %5224 = vmatmul.mubr.msk.bf16.gmra.mrb[16].mxu0 %vm383_vm1, %v6473_v33  ;;  %5031 = vmatprep.mubr.msk.bf16.mxu1 %vm383_vm1, %v2029_v12  ;;  %v2051_v33 = vshrl.u32 %v6118_v48, 16 }
 0x191   : > { %5227 = vmatprep.mubr.msk.bf16.mxu0 %vm383_vm1, %v6488_v49  ;;  %v2049_v49 = vrot.slane %v2047_v10, 1 }
 0x193   : > { %v2053_v59 = vor.u32 %v2051_v33, %v2049_v49  ;;  %v2050_v48 = vsel %vm1412_vm2, %v2046_v26, %v2049_v49 }
 0x195   : > { %v2057_v11 = vsel %vm1412_vm2, %v2053_v59, %v2056_v37 }
 0x197   : > { %5032 = vmatmul.mubr.msk.bf16.vlgmr.msra.gmra.mrb[24].mxu1 %vm383_vm1, %v2036_v20 }
 0x198   : > { %5228 = vmatmul.mubr.msk.bf16.gmra.mrb[20].mxu0 %vm383_vm1, %v6491_v29  ;;  %5035 = vmatprep.mubr.msk.bf16.mxu1 %vm383_vm1, %v2043_v43  ;;  %v2065_v29 = vshrl.u32 %v6133_v9, 16 }
 0x199   : > { %5231 = vmatprep.mubr.msk.bf16.mxu0 %vm383_vm1, %v6504_v42  ;;  %v2063_v42 = vrot.slane %v2061_v52, 1 }
 0x19b   : > { %v2067_v35 = vor.u32 %v2065_v29, %v2063_v42  ;;  %v2064_v9 = vsel %vm1412_vm2, %v2060_v27, %v2063_v42  ;;  %v6865_v42 = vld [vmem:[%s7041_s2] ss:$0 sm:$0xff] }
 0x19d   : > { %v2071_v44 = vsel %vm1412_vm2, %v2067_v35, %v2070_v55 }
 0x19f   : > { %5036 = vmatmul.mubr.msk.bf16.gmra.mrb[28].mxu1 %vm383_vm1, %v2050_v48 }
 0x1a0   : > { %5232 = vmatmul.mubr.msk.bf16.gmra.mrb[24].mxu0 %vm383_vm1, %v6507_v19  ;;  %5039 = vmatprep.mubr.msk.bf16.mxu1 %vm383_vm1, %v2057_v11  ;;  %v2079_v19 = vshrl.u32 %v7118_v51, 16 }
 0x1a1   : > { %5235 = vmatprep.mubr.msk.bf16.mxu0 %vm383_vm1, %v6520_v38  ;;  %v2077_v38 = vrot.slane %v2075_v4, 1 }
 0x1a3   : > { %v2081_v28 = vor.u32 %v2079_v19, %v2077_v38  ;;  %v2078_v51 = vsel %vm1412_vm2, %v2074_v22, %v2077_v38 }
 0x1a5   : > { %v2085_v31 = vsel %vm1412_vm2, %v2081_v28, %v2084_v53 }
 0x1a7   : > { %5040 = vmatmul.mubr.msk.bf16.gmra.mrb[32].mxu1 %vm383_vm1, %v2064_v9 }
 0x1a8   : > { %5236 = vmatmul.mubr.msk.bf16.gmra.mrb[28].mxu0 %vm383_vm1, %v6523_v15  ;;  %5043 = vmatprep.mubr.msk.bf16.mxu1 %vm383_vm1, %v2071_v44  ;;  %v2093_v15 = vshrl.u32 %v7122_v23, 16 }
 0x1a9   : > { %5239 = vmatprep.mubr.msk.bf16.mxu0 %vm383_vm1, %v6536_v61  ;;  %v2091_v61 = vrot.slane %v2089_v60, 1 }
 0x1ab   : > { %v2095_v13 = vor.u32 %v2093_v15, %v2091_v61  ;;  %v2092_v23 = vsel %vm1412_vm2, %v2088_v32, %v2091_v61 }
 0x1ad   : > { %v2099_v5 = vsel %vm1412_vm2, %v2095_v13, %v2098_v17 }
 0x1af   : > { %5044 = vmatmul.mubr.msk.bf16.gmra.mrb[36].mxu1 %vm383_vm1, %v2078_v51 }
 0x1b0   : > { %5240 = vmatmul.mubr.msk.bf16.gmra.mrb[32].mxu0 %vm383_vm1, %v6539_v46  ;;  %5047 = vmatprep.mubr.msk.bf16.mxu1 %vm383_vm1, %v2085_v31  ;;  %v3577_v46 = vsel %vm2777_vm3, %v6551_v14, %v3576_v36 }
 0x1b1   : > { %5243 = vmatprep.mubr.msk.bf16.mxu0 %vm383_vm1, %v6554_v1  ;;  %v2102_v1 = vor.u32 %v2100_v63, %v2098_v17 }
 0x1b3   : > { %v2107_v14 = vsel %vm1412_vm2, %v2102_v1, %v2106_v6 }
 0x1b7   : > { %5048 = vmatmul.mubr.msk.bf16.gmra.mrb[40].mxu1 %vm383_vm1, %v2092_v23 }
 0x1b8   : > { %5244 = vmatmul.mubr.msk.bf16.gmra.mrb[36].mxu0 %vm383_vm1, %v6562_v16  ;;  %5051 = vmatprep.mubr.msk.bf16.mxu1 %vm383_vm1, %v2099_v5  ;;  %v7155_v16 = vld [vmem:[#allocation34_spill] sm:$0xff] }
 0x1b9   : > { %5247 = vmatprep.mubr.msk.bf16.mxu0 %vm383_vm1, %v3577_v46  ;;  %v3582_v62 = vrot.slane %v7155_v16, 1 }
 0x1bb   : > { %v3583_v58 = vsel %vm2777_vm3, %v3580_v2, %v3582_v62 }
 0x1bf   : > { %5052 = vmatmul.mubr.msk.bf16.gmra.mrb[44].mxu1 %vm383_vm1, %v2107_v14 }
 0x1c0   : > { %5248 = vmatmul.mubr.msk.bf16.gmra.mrb[40].mxu0 %vm383_vm1, %v3579_v54 }
 0x1c1   : > { %5251 = vmatprep.mubr.msk.bf16.mxu0 %vm383_vm1, %v3581_v45 }
 0x1c8   : > { %5252 = vmatmul.mubr.msk.bf16.gmra.mrb[44].mxu0 %vm383_vm1, %v3583_v58 }
 0x20a   : > { %v4959_v12 = vpop.f32.mrb[0].mxu1 }
 0x20b   : > { %v1694_v47 = vpop.f32.mrb[1].mxu1  ;;  %v5257_v27 = vadd.f32 %v4959_v12, %v6865_v42 }
 0x20c   : > { %v4960_v50 = vpop.f32.mrb[2].mxu1  ;;  %v5259_v35 = vadd.f32 %v6865_v42, %v1694_v47 }
 0x20d   : > { %v1697_v8 = vpop.f32.mrb[3].mxu1  ;;  %v5261_v4 = vadd.f32 %v4960_v50, %v6865_v42 }
 0x20e   : > { %v5263_v44 = vadd.f32 %v6865_v42, %v1697_v8 }
 0x212   : > { %v4963_v24 = vpop.f32.mrb[4].mxu1 }
 0x213   : > { %v1710_v25 = vpop.f32.mrb[5].mxu1  ;;  %v5265_v31 = vadd.f32 %v4963_v24, %v6865_v42 }
 0x214   : > { %v4964_v18 = vpop.f32.mrb[6].mxu1  ;;  %v5267_v15 = vadd.f32 %v6865_v42, %v1710_v25 }
 0x215   : > { %v1713_v3 = vpop.f32.mrb[7].mxu1  ;;  %v5269_v61 = vadd.f32 %v4964_v18, %v6865_v42 }
 0x216   : > { %v5271_v13 = vadd.f32 %v6865_v42, %v1713_v3 }
 0x21a   : > { %v4967_v10 = vpop.f32.mrb[8].mxu1 }
 0x21b   : > { %v1726_v20 = vpop.f32.mrb[9].mxu1  ;;  %v5273_v2 = vadd.f32 %v4967_v10, %v6865_v42 }
 0x21c   : > { %v4968_v30 = vpop.f32.mrb[10].mxu1  ;;  %v5275_v54 = vadd.f32 %v6865_v42, %v1726_v20 }
 0x21d   : > { %v6836_v43 = vpop.f32.mrb[11].mxu1  ;;  %v5277_v45 = vadd.f32 %v4968_v30, %v6865_v42 }
 0x21e   : > { %v5279_v58 = vadd.f32 %v6865_v42, %v6836_v43 }
 0x222   : > { %v6838_v33 = vpop.f32.mrb[12].mxu1 }
 0x223   : > { %v6840_v57 = vpop.f32.mrb[13].mxu1  ;;  %v5281_v20 = vadd.f32 %v6838_v33, %v6865_v42 }
 0x224   : > { %v6842_v49 = vpop.f32.mrb[14].mxu1  ;;  %v5283_v30 = vadd.f32 %v6865_v42, %v6840_v57 }
 0x225   : > { %v6844_v26 = vpop.f32.mrb[15].mxu1 }
 0x226   : > { %v5287_v33 = vadd.f32 %v6865_v42, %v6844_v26 }
 0x22a   : > { %v6846_v59 = vpop.f32.mrb[16].mxu1 }
 0x22b   : > { %v6848_v37 = vpop.f32.mrb[17].mxu1 }
 0x22c   : > { %v6850_v52 = vpop.f32.mrb[18].mxu1  ;;  %v5291_v26 = vadd.f32 %v6865_v42, %v6848_v37 }
 0x22d   : > { %v6852_v48 = vpop.f32.mrb[19].mxu1 }
 0x232   : > { %v6854_v0 = vpop.f32.mrb[20].mxu1 }
 0x233   : > { %v6856_v11 = vpop.f32.mrb[21].mxu1 }
 0x234   : > { %v6858_v29 = vpop.f32.mrb[22].mxu1 }
 0x235   : > { %v6860_v39 = vpop.f32.mrb[23].mxu1 }
 0x243   : > { %v5209_v55 = vpop.f32.mrb[0].mxu0 }
 0x244   : > { %v5258_v9 = vadd.f32 %v5257_v27, %v5209_v55  ;;  %v3633_v34 = vpop.f32.mrb[1].mxu0  ;;  %v5285_v27 = vadd.f32 %v6842_v49, %v6865_v42 }
 0x245   : > { %v5260_v19 = vadd.f32 %v5259_v35, %v3633_v34  ;;  %v5210_v56 = vpop.f32.mrb[2].mxu0 }
 0x246   : > { %v4534_v38 = vpack.c.bf16 %v5258_v9, %v5258_v9  ;;  %v5262_v22 = vadd.f32 %v5261_v4, %v5210_v56  ;;  %v3636_v28 = vpop.f32.mrb[3].mxu0 }
 0x247   : > { %v4532_v53 = vpack.c.bf16 %v5260_v19, %v5260_v19  ;;  %v5264_v60 = vadd.f32 %v5263_v44, %v3636_v28 }
 0x248   : > { %4067 = vst.msk [vmem:[%s6875_s20 + $0x8] sm:$0xf] %vm4064_vm4, %v4534_v38  ;;  %v4535_v51 = vpack.c.bf16 %v5262_v22, %v5262_v22  ;;  %v5289_v22 = vadd.f32 %v6846_v59, %v6865_v42  ;;  %v5295_v59 = vadd.f32 %v6865_v42, %v6852_v48  ;;  %v5299_v48 = vadd.f32 %v6865_v42, %v6856_v11 }
 0x249   : > { %4065 = vst.msk [vmem:[%s6875_s20] sm:$0xf] %vm4064_vm4, %v4532_v53  ;;  %v4533_v21 = vpack.c.bf16 %v5264_v60, %v5264_v60  ;;  %v5293_v53 = vadd.f32 %v6850_v52, %v6865_v42 }
 0x24a   : > { %4068 = vst.msk [vmem:[%s6875_s20 + $0xc] sm:$0xf] %vm4064_vm4, %v4535_v51 }
 0x24b   : > { %4066 = vst.msk [vmem:[%s6875_s20 + $0x4] sm:$0xf] %vm4064_vm4, %v4533_v21  ;;  %v5213_v40 = vpop.f32.mrb[4].mxu0 }
 0x24c   : > { %v5266_v32 = vadd.f32 %v5265_v31, %v5213_v40  ;;  %v3649_v36 = vpop.f32.mrb[5].mxu0 }
 0x24d   : > { %v5268_v17 = vadd.f32 %v5267_v15, %v3649_v36  ;;  %v5214_v23 = vpop.f32.mrb[6].mxu0 }
 0x24e   : > { %v4538_v63 = vpack.c.bf16 %v5266_v32, %v5266_v32  ;;  %v5270_v7 = vadd.f32 %v5269_v61, %v5214_v23  ;;  %v3652_v46 = vpop.f32.mrb[7].mxu0 }
 0x24f   : > { %v4536_v5 = vpack.c.bf16 %v5268_v17, %v5268_v17  ;;  %v5272_v41 = vadd.f32 %v5271_v13, %v3652_v46  ;;  %v5297_v13 = vadd.f32 %v6854_v0, %v6865_v42  ;;  %v5303_v0 = vadd.f32 %v6865_v42, %v6860_v39 }
 0x250   : > { %4071 = vst.msk [vmem:[%s6875_s20 + $0x18] sm:$0xf] %vm4064_vm4, %v4538_v63  ;;  %v4539_v1 = vpack.c.bf16 %v5270_v7, %v5270_v7  ;;  %v5301_v63 = vadd.f32 %v6858_v29, %v6865_v42 }
 0x251   : > { %4069 = vst.msk [vmem:[%s6875_s20 + $0x10] sm:$0xf] %vm4064_vm4, %v4536_v5  ;;  %v4537_v6 = vpack.c.bf16 %v5272_v41, %v5272_v41 }
 0x252   : > { %4072 = vst.msk [vmem:[%s6875_s20 + $0x1c] sm:$0xf] %vm4064_vm4, %v4539_v1 }
 0x253   : > { %4070 = vst.msk [vmem:[%s6875_s20 + $0x14] sm:$0xf] %vm4064_vm4, %v4537_v6  ;;  %v5217_v14 = vpop.f32.mrb[8].mxu0 }
 0x254   : > { %v5274_v16 = vadd.f32 %v5273_v2, %v5217_v14  ;;  %v3665_v62 = vpop.f32.mrb[9].mxu0 }
 0x255   : > { %v5276_v12 = vadd.f32 %v5275_v54, %v3665_v62  ;;  %v5218_v47 = vpop.f32.mrb[10].mxu0 }
 0x256   : > { %v4542_v50 = vpack.c.bf16 %v5274_v16, %v5274_v16  ;;  %v5278_v8 = vadd.f32 %v5277_v45, %v5218_v47  ;;  %v3668_v24 = vpop.f32.mrb[11].mxu0 }
 0x257   : > { %v4540_v25 = vpack.c.bf16 %v5276_v12, %v5276_v12  ;;  %v5280_v18 = vadd.f32 %v5279_v58, %v3668_v24 }
 0x258   : > { %4075 = vst.msk [vmem:[%s6875_s20 + $0x28] sm:$0xf] %vm4064_vm4, %v4542_v50  ;;  %v4543_v3 = vpack.c.bf16 %v5278_v8, %v5278_v8 }
 0x259   : > { %4073 = vst.msk [vmem:[%s6875_s20 + $0x20] sm:$0xf] %vm4064_vm4, %v4540_v25  ;;  %v4541_v10 = vpack.c.bf16 %v5280_v18, %v5280_v18 }
 0x25a   : > { %4076 = vst.msk [vmem:[%s6875_s20 + $0x2c] sm:$0xf] %vm4064_vm4, %v4543_v3 }
 0x25b   : > { %4074 = vst.msk [vmem:[%s6875_s20 + $0x24] sm:$0xf] %vm4064_vm4, %v4541_v10  ;;  %v5221_v43 = vpop.f32.mrb[12].mxu0 }
 0x25c   : > { %v5282_v35 = vadd.f32 %v5281_v20, %v5221_v43  ;;  %v3681_v55 = vpop.f32.mrb[13].mxu0 }
 0x25d   : > { %v5284_v4 = vadd.f32 %v5283_v30, %v3681_v55  ;;  %v5222_v9 = vpop.f32.mrb[14].mxu0 }
 0x25e   : > { %v4546_v34 = vpack.c.bf16 %v5282_v35, %v5282_v35  ;;  %v5286_v44 = vadd.f32 %v5285_v27, %v5222_v9  ;;  %v3684_v19 = vpop.f32.mrb[15].mxu0 }
 0x25f   : > { %v4544_v57 = vpack.c.bf16 %v5284_v4, %v5284_v4  ;;  %v5288_v56 = vadd.f32 %v5287_v33, %v3684_v19 }
 0x260   : > { %4079 = vst.msk [vmem:[%s6875_s20 + $0x38] sm:$0xf] %vm4064_vm4, %v4546_v34  ;;  %v4547_v38 = vpack.c.bf16 %v5286_v44, %v5286_v44 }
 0x261   : > { %4077 = vst.msk [vmem:[%s6875_s20 + $0x30] sm:$0xf] %vm4064_vm4, %v4544_v57  ;;  %v4545_v49 = vpack.c.bf16 %v5288_v56, %v5288_v56 }
 0x262   : > { %4080 = vst.msk [vmem:[%s6875_s20 + $0x3c] sm:$0xf] %vm4064_vm4, %v4547_v38 }
 0x263   : > { %4078 = vst.msk [vmem:[%s6875_s20 + $0x34] sm:$0xf] %vm4064_vm4, %v4545_v49  ;;  %v5225_v28 = vpop.f32.mrb[16].mxu0 }
 0x264   : > { %v5290_v60 = vadd.f32 %v5289_v22, %v5225_v28  ;;  %v3697_v51 = vpop.f32.mrb[17].mxu0 }
 0x265   : > { %v5292_v21 = vadd.f32 %v5291_v26, %v3697_v51  ;;  %v5226_v31 = vpop.f32.mrb[18].mxu0 }
 0x266   : > { %v4550_v15 = vpack.c.bf16 %v5290_v60, %v5290_v60  ;;  %v5294_v40 = vadd.f32 %v5293_v53, %v5226_v31  ;;  %v3700_v61 = vpop.f32.mrb[19].mxu0 }
 0x267   : > { %v4548_v37 = vpack.c.bf16 %v5292_v21, %v5292_v21  ;;  %v5296_v32 = vadd.f32 %v5295_v59, %v3700_v61 }
 0x268   : > { %4083 = vst.msk [vmem:[%s6875_s20 + $0x48] sm:$0xf] %vm4064_vm4, %v4550_v15  ;;  %v4551_v36 = vpack.c.bf16 %v5294_v40, %v5294_v40 }
 0x269   : > { %4081 = vst.msk [vmem:[%s6875_s20 + $0x40] sm:$0xf] %vm4064_vm4, %v4548_v37  ;;  %v4549_v52 = vpack.c.bf16 %v5296_v32, %v5296_v32 }
 0x26a   : > { %4084 = vst.msk [vmem:[%s6875_s20 + $0x4c] sm:$0xf] %vm4064_vm4, %v4551_v36  ;;  %v5033_v23 = vpop.f32.mrb[24].mxu1 }
 0x26b   : > { %4082 = vst.msk [vmem:[%s6875_s20 + $0x44] sm:$0xf] %vm4064_vm4, %v4549_v52  ;;  %v5229_v17 = vpop.f32.mrb[20].mxu0  ;;  %v2313_v5 = vpop.f32.mrb[25].mxu1  ;;  %v5305_v58 = vadd.f32 %v5033_v23, %v6865_v42 }
 0x26c   : > { %v5298_v7 = vadd.f32 %v5297_v13, %v5229_v17  ;;  %v3713_v46 = vpop.f32.mrb[21].mxu0  ;;  %v5034_v11 = vpop.f32.mrb[26].mxu1  ;;  %v5307_v39 = vadd.f32 %v6865_v42, %v2313_v5 }
 0x26d   : > { %v5300_v41 = vadd.f32 %v5299_v48, %v3713_v46  ;;  %v5230_v1 = vpop.f32.mrb[22].mxu0  ;;  %v2316_v14 = vpop.f32.mrb[27].mxu1  ;;  %v5309_v50 = vadd.f32 %v5034_v11, %v6865_v42 }
 0x26e   : > { %v4554_v6 = vpack.c.bf16 %v5298_v7, %v5298_v7  ;;  %v5302_v2 = vadd.f32 %v5301_v63, %v5230_v1  ;;  %v3716_v54 = vpop.f32.mrb[23].mxu0  ;;  %v5311_v18 = vadd.f32 %v6865_v42, %v2316_v14 }
 0x26f   : > { %v4552_v45 = vpack.c.bf16 %v5300_v41, %v5300_v41  ;;  %v5304_v16 = vadd.f32 %v5303_v0, %v3716_v54 }
 0x270   : > { %4087 = vst.msk [vmem:[%s6875_s20 + $0x58] sm:$0xf] %vm4064_vm4, %v4554_v6  ;;  %v4555_v29 = vpack.c.bf16 %v5302_v2, %v5302_v2 }
 0x271   : > { %4085 = vst.msk [vmem:[%s6875_s20 + $0x50] sm:$0xf] %vm4064_vm4, %v4552_v45  ;;  %v4553_v62 = vpack.c.bf16 %v5304_v16, %v5304_v16 }
 0x272   : > { %4088 = vst.msk [vmem:[%s6875_s20 + $0x5c] sm:$0xf] %vm4064_vm4, %v4555_v29  ;;  %v5037_v47 = vpop.f32.mrb[28].mxu1 }
 0x273   : > { %4086 = vst.msk [vmem:[%s6875_s20 + $0x54] sm:$0xf] %vm4064_vm4, %v4553_v62  ;;  %v5233_v12 = vpop.f32.mrb[24].mxu0  ;;  %v2329_v25 = vpop.f32.mrb[29].mxu1  ;;  %v5313_v34 = vadd.f32 %v5037_v47, %v6865_v42 }
 0x274   : > { %v5306_v8 = vadd.f32 %v5305_v58, %v5233_v12  ;;  %v3729_v24 = vpop.f32.mrb[25].mxu0  ;;  %v5038_v20 = vpop.f32.mrb[30].mxu1  ;;  %v5315_v44 = vadd.f32 %v6865_v42, %v2329_v25 }
 0x275   : > { %v5308_v3 = vadd.f32 %v5307_v39, %v3729_v24  ;;  %v5234_v10 = vpop.f32.mrb[26].mxu0  ;;  %v2332_v35 = vpop.f32.mrb[31].mxu1  ;;  %v5317_v56 = vadd.f32 %v5038_v20, %v6865_v42 }
 0x276   : > { %v4558_v30 = vpack.c.bf16 %v5306_v8, %v5306_v8  ;;  %v5310_v43 = vadd.f32 %v5309_v50, %v5234_v10  ;;  %v3732_v27 = vpop.f32.mrb[27].mxu0  ;;  %v5319_v26 = vadd.f32 %v6865_v42, %v2332_v35 }
 0x277   : > { %v4556_v55 = vpack.c.bf16 %v5308_v3, %v5308_v3  ;;  %v5312_v33 = vadd.f32 %v5311_v18, %v3732_v27 }
 0x278   : > { %4091 = vst.msk [vmem:[%s6875_s20 + $0x68] sm:$0xf] %vm4064_vm4, %v4558_v30  ;;  %v4559_v4 = vpack.c.bf16 %v5310_v43, %v5310_v43 }
 0x279   : > { %4089 = vst.msk [vmem:[%s6875_s20 + $0x60] sm:$0xf] %vm4064_vm4, %v4556_v55  ;;  %v4557_v9 = vpack.c.bf16 %v5312_v33, %v5312_v33 }
 0x27a   : > { %4092 = vst.msk [vmem:[%s6875_s20 + $0x6c] sm:$0xf] %vm4064_vm4, %v4559_v4  ;;  %v5041_v57 = vpop.f32.mrb[32].mxu1 }
 0x27b   : > { %4090 = vst.msk [vmem:[%s6875_s20 + $0x64] sm:$0xf] %vm4064_vm4, %v4557_v9  ;;  %v5237_v19 = vpop.f32.mrb[28].mxu0  ;;  %v2345_v22 = vpop.f32.mrb[33].mxu1  ;;  %v5321_v32 = vadd.f32 %v5041_v57, %v6865_v42 }
 0x27c   : > { %v5314_v38 = vadd.f32 %v5313_v34, %v5237_v19  ;;  %v3745_v49 = vpop.f32.mrb[29].mxu0  ;;  %v5042_v60 = vpop.f32.mrb[34].mxu1  ;;  %v5323_v36 = vadd.f32 %v6865_v42, %v2345_v22 }
 0x27d   : > { %v5316_v28 = vadd.f32 %v5315_v44, %v3745_v49  ;;  %v5238_v53 = vpop.f32.mrb[30].mxu0  ;;  %v2348_v31 = vpop.f32.mrb[35].mxu1  ;;  %v5325_v48 = vadd.f32 %v5042_v60, %v6865_v42 }
 0x27e   : > { %v4562_v51 = vpack.c.bf16 %v5314_v38, %v5314_v38  ;;  %v5318_v59 = vadd.f32 %v5317_v56, %v5238_v53  ;;  %v3748_v21 = vpop.f32.mrb[31].mxu0  ;;  %v5327_v7 = vadd.f32 %v6865_v42, %v2348_v31 }
 0x27f   : > { %v4560_v15 = vpack.c.bf16 %v5316_v28, %v5316_v28  ;;  %v5320_v40 = vadd.f32 %v5319_v26, %v3748_v21 }
 0x280   : > { %4095 = vst.msk [vmem:[%s6875_s20 + $0x78] sm:$0xf] %vm4064_vm4, %v4562_v51  ;;  %v4563_v61 = vpack.c.bf16 %v5318_v59, %v5318_v59 }
 0x281   : > { %4093 = vst.msk [vmem:[%s6875_s20 + $0x70] sm:$0xf] %vm4064_vm4, %v4560_v15  ;;  %v4561_v37 = vpack.c.bf16 %v5320_v40, %v5320_v40 }
 0x282   : > { %4096 = vst.msk [vmem:[%s6875_s20 + $0x7c] sm:$0xf] %vm4064_vm4, %v4563_v61  ;;  %v5045_v13 = vpop.f32.mrb[36].mxu1 }
 0x283   : > { %4094 = vst.msk [vmem:[%s6875_s20 + $0x74] sm:$0xf] %vm4064_vm4, %v4561_v37  ;;  %v5241_v52 = vpop.f32.mrb[32].mxu0  ;;  %v2361_v63 = vpop.f32.mrb[37].mxu1  ;;  %v5329_v16 = vadd.f32 %v5045_v13, %v6865_v42 }
 0x284   : > { %v5322_v17 = vadd.f32 %v5321_v32, %v5241_v52  ;;  %v3761_v23 = vpop.f32.mrb[33].mxu0  ;;  %v5046_v0 = vpop.f32.mrb[38].mxu1  ;;  %v5331_v29 = vadd.f32 %v6865_v42, %v2361_v63 }
 0x285   : > { %v5324_v46 = vadd.f32 %v5323_v36, %v3761_v23  ;;  %v5242_v5 = vpop.f32.mrb[34].mxu0  ;;  %v2364_v6 = vpop.f32.mrb[39].mxu1  ;;  %v5333_v39 = vadd.f32 %v5046_v0, %v6865_v42 }
 0x286   : > { %v4566_v41 = vpack.c.bf16 %v5322_v17, %v5322_v17  ;;  %v5326_v1 = vadd.f32 %v5325_v48, %v5242_v5  ;;  %v3764_v11 = vpop.f32.mrb[35].mxu0  ;;  %v5335_v8 = vadd.f32 %v6865_v42, %v2364_v6 }
 0x287   : > { %v4564_v2 = vpack.c.bf16 %v5324_v46, %v5324_v46  ;;  %v5328_v54 = vadd.f32 %v5327_v7, %v3764_v11 }
 0x288   : > { %4099 = vst.msk [vmem:[%s6875_s20 + $0x88] sm:$0xf] %vm4064_vm4, %v4566_v41  ;;  %v4567_v14 = vpack.c.bf16 %v5326_v1, %v5326_v1 }
 0x289   : > { %4097 = vst.msk [vmem:[%s6875_s20 + $0x80] sm:$0xf] %vm4064_vm4, %v4564_v2  ;;  %v4565_v45 = vpack.c.bf16 %v5328_v54, %v5328_v54 }
 0x28a   : > { %4100 = vst.msk [vmem:[%s6875_s20 + $0x8c] sm:$0xf] %vm4064_vm4, %v4567_v14  ;;  %v5049_v58 = vpop.f32.mrb[40].mxu1 }
 0x28b   : > { %4098 = vst.msk [vmem:[%s6875_s20 + $0x84] sm:$0xf] %vm4064_vm4, %v4565_v45  ;;  %v5245_v62 = vpop.f32.mrb[36].mxu0  ;;  %v2377_v50 = vpop.f32.mrb[41].mxu1  ;;  %v5337_v33 = vadd.f32 %v5049_v58, %v6865_v42 }
 0x28c   : > { %v5330_v12 = vadd.f32 %v5329_v16, %v5245_v62  ;;  %v3777_v47 = vpop.f32.mrb[37].mxu0  ;;  %v5050_v18 = vpop.f32.mrb[42].mxu1  ;;  %v5339_v4 = vadd.f32 %v6865_v42, %v2377_v50 }
 0x28d   : > { %v5332_v24 = vadd.f32 %v5331_v29, %v3777_v47  ;;  %v5246_v25 = vpop.f32.mrb[38].mxu0  ;;  %v2380_v30 = vpop.f32.mrb[43].mxu1  ;;  %v5341_v44 = vadd.f32 %v5050_v18, %v6865_v42 }
 0x28e   : > { %v4570_v3 = vpack.c.bf16 %v5330_v12, %v5330_v12  ;;  %v5334_v10 = vadd.f32 %v5333_v39, %v5246_v25  ;;  %v3780_v20 = vpop.f32.mrb[39].mxu0  ;;  %v5343_v38 = vadd.f32 %v6865_v42, %v2380_v30 }
 0x28f   : > { %v4568_v43 = vpack.c.bf16 %v5332_v24, %v5332_v24  ;;  %v5336_v27 = vadd.f32 %v5335_v8, %v3780_v20 }
 0x290   : > { %4103 = vst.msk [vmem:[%s6875_s20 + $0x98] sm:$0xf] %vm4064_vm4, %v4570_v3  ;;  %v4571_v35 = vpack.c.bf16 %v5334_v10, %v5334_v10 }
 0x291   : > { %4101 = vst.msk [vmem:[%s6875_s20 + $0x90] sm:$0xf] %vm4064_vm4, %v4568_v43  ;;  %v4569_v55 = vpack.c.bf16 %v5336_v27, %v5336_v27 }
 0x292   : > { %4104 = vst.msk [vmem:[%s6875_s20 + $0x9c] sm:$0xf] %vm4064_vm4, %v4571_v35  ;;  %v5053_v34 = vpop.f32.mrb[44].mxu1 }
 0x293   : > { %4102 = vst.msk [vmem:[%s6875_s20 + $0x94] sm:$0xf] %vm4064_vm4, %v4569_v55  ;;  %v5249_v9 = vpop.f32.mrb[40].mxu0  ;;  %v2393_v56 = vpop.f32.mrb[45].mxu1  ;;  %v5345_v40 = vadd.f32 %v5053_v34, %v6865_v42 }
 0x294   : > { %v5338_v19 = vadd.f32 %v5337_v33, %v5249_v9  ;;  %v3793_v57 = vpop.f32.mrb[41].mxu0  ;;  %v5054_v26 = vpop.f32.mrb[46].mxu1  ;;  %v5347_v61 = vadd.f32 %v6865_v42, %v2393_v56 }
 0x295   : > { %v5340_v49 = vadd.f32 %v5339_v4, %v3793_v57  ;;  %v5250_v22 = vpop.f32.mrb[42].mxu0  ;;  %v2396_v51 = vpop.f32.mrb[47].mxu1  ;;  %v5349_v32 = vadd.f32 %v5054_v26, %v6865_v42 }
 0x296   : > { %v4574_v28 = vpack.c.bf16 %v5338_v19, %v5338_v19  ;;  %v5342_v53 = vadd.f32 %v5341_v44, %v5250_v22  ;;  %v3796_v60 = vpop.f32.mrb[43].mxu0  ;;  %v5351_v13 = vadd.f32 %v6865_v42, %v2396_v51 }
 0x297   : > { %v4572_v59 = vpack.c.bf16 %v5340_v49, %v5340_v49  ;;  %v5344_v21 = vadd.f32 %v5343_v38, %v3796_v60 }
 0x298   : > { %4107 = vst.msk [vmem:[%s6875_s20 + $0xa8] sm:$0xf] %vm4064_vm4, %v4574_v28  ;;  %v4575_v31 = vpack.c.bf16 %v5342_v53, %v5342_v53 }
 0x299   : > { %4105 = vst.msk [vmem:[%s6875_s20 + $0xa0] sm:$0xf] %vm4064_vm4, %v4572_v59  ;;  %v4573_v15 = vpack.c.bf16 %v5344_v21, %v5344_v21 }
 0x29a   : > { %4108 = vst.msk [vmem:[%s6875_s20 + $0xac] sm:$0xf] %vm4064_vm4, %v4575_v31 }
 0x29b   : > { %4106 = vst.msk [vmem:[%s6875_s20 + $0xa4] sm:$0xf] %vm4064_vm4, %v4573_v15  ;;  %v5253_v37 = vpop.f32.mrb[44].mxu0 }
 0x29c   : > { %v5346_v36 = vadd.f32 %v5345_v40, %v5253_v37  ;;  %v3809_v52 = vpop.f32.mrb[45].mxu0 }
 0x29d   : > { %v5348_v48 = vadd.f32 %v5347_v61, %v3809_v52  ;;  %v5254_v17 = vpop.f32.mrb[46].mxu0 }
 0x29e   : > { %v4578_v23 = vpack.c.bf16 %v5346_v36, %v5346_v36  ;;  %v5350_v63 = vadd.f32 %v5349_v32, %v5254_v17  ;;  %v3812_v7 = vpop.f32.mrb[47].mxu0 }
 0x29f   : > { %v4576_v46 = vpack.c.bf16 %v5348_v48, %v5348_v48  ;;  %v5352_v5 = vadd.f32 %v5351_v13, %v3812_v7 }
 0x2a0   : > { %4111 = vst.msk [vmem:[%s6875_s20 + $0xb8] sm:$0xf] %vm4064_vm4, %v4578_v23  ;;  %v4579_v0 = vpack.c.bf16 %v5350_v63, %v5350_v63 }
 0x2a1   : > { %4109 = vst.msk [vmem:[%s6875_s20 + $0xb0] sm:$0xf] %vm4064_vm4, %v4576_v46  ;;  %v4577_v41 = vpack.c.bf16 %v5352_v5, %v5352_v5 }
 0x2a2   : > { %4112 = vst.msk [vmem:[%s6875_s20 + $0xbc] sm:$0xf] %vm4064_vm4, %v4579_v0 }
 0x2a3   : > { %4110 = vst.msk [vmem:[%s6875_s20 + $0xb4] sm:$0xf] %vm4064_vm4, %v4577_v41 }
 0x2a4 PF: > { %s13_s14 = sadd.s32 1, %s5802_s14   ;;  %s7156_s12 = smov %s5798_s13 }
 0x2a5   : > { %p10_p5 = scmp.ge.s32.totalorder %s13_s14, 4   ;;  %s7157_s13 = smov %s7159_s15 }
 0x2a7   :  { %12 = sbr.rel (!%p10_p5) target bundleno = 2 (0x2), region = 71 }

</bundles_post_ra>
